<compile_context>
chip_gen: v5e
topology: v5e:2x2
jax: 0.10.0
libtpu: 0.0.40
codegen_flags: <defaults>
</compile_context>

<pallas_src>
import math
from functools import lru_cache, partial

import jax
import jax.numpy as jnp
from jax.experimental import pallas as pl
from jax.experimental.pallas import tpu as pltpu


# ------------------------- generation-aware VMEM budget ----------------------

@lru_cache(maxsize=None)
def _vmem_limits():
    """(working-set budget for tile picking, scoped limit handed to Mosaic)."""
    phys = 64 * 1024 * 1024                       # conservative floor (v7x)
    try:
        cap = getattr(pltpu.get_tpu_info(), "vmem_capacity_bytes", None)
        if cap:
            phys = int(cap)
    except Exception:
        pass
    budget = int(min(phys // 2, 64 * 1024 * 1024))        # v5e/v6e: 64M, v7x: 32M
    limit = int(min((phys * 3) // 4, 100 * 1024 * 1024))  # v5e/v6e: ~96M, v7x: 48M
    return budget, limit


@lru_cache(maxsize=None)
def _default_conv_compute_dtype():
    # bf16 VALU exists on v6e/v7x; older generations keep f32 intermediates
    # (no bf16 VALU there, so bf16 would only add cast traffic).
    try:
        kind = jax.devices()[0].device_kind.lower()
    except Exception:
        return jnp.float32
    if any(tag in kind for tag in ("v6", "v7", "7x")):
        return jnp.bfloat16
    return jnp.float32


def _round_up(x, m):
    return ((x + m - 1) // m) * m


# ----------------------------- linear (fc1 / fc2) ----------------------------

def _linear_kernel(x_ref, w_ref, b_ref, o_ref):
    acc = jnp.dot(x_ref[...], w_ref[...], preferred_element_type=jnp.float32)
    o_ref[...] = (acc + b_ref[...]).astype(o_ref.dtype)


def _pick_linear_tiles(M, K, N, operand_bytes, out_bytes, budget):
    # N (lane) tiling: keep the full width when small / not 256-aligned.
    if N <= 512 or N % 256 != 0:
        tn = N
    elif N % 512 == 0:
        tn = 512
    else:
        tn = 256

    def fits(tm):
        # double-buffered x / w / bias / out blocks
        return 2 * (tm * K * operand_bytes + K * tn * operand_bytes
                    + tn * 4 + tm * tn * out_bytes) <= budget

    # Prefer large MXU-aligned M tiles even when M must be zero-padded:
    # padding a few % of rows is far cheaper than re-DMAing the weight tile
    # 8-50x more often with tiny tiles.
    m_cap = max(8, _round_up(M, 8))
    candidates = [c for c in (512, 256, 128, 64, 32, 16, 8) if c < m_cap]
    if m_cap <= 512:
        candidates = [m_cap] + candidates
    for tm in candidates:
        if fits(tm):
            return tm, tn
    raise ValueError(
        f"linear(): no (tm, tn) tile fits the VMEM budget "
        f"(M={M}, K={K}, N={N}, budget={budget} bytes)")


def linear(x, w, b, *, out_dtype=jnp.bfloat16, operand_dtype=jnp.bfloat16):
    """y = x @ w + b.  operand_dtype matmul operands, f32 accumulate/bias."""
    M, K = x.shape
    Kw, N = w.shape
    assert K == Kw
    budget, vmem_limit = _vmem_limits()
    ob = jnp.dtype(operand_dtype).itemsize
    outb = jnp.dtype(out_dtype).itemsize
    tm, tn = _pick_linear_tiles(M, K, N, ob, outb, budget)

    xb = x.astype(operand_dtype)
    wb = w.astype(operand_dtype)
    bb = b.reshape(1, N).astype(jnp.float32)

    Mp = _round_up(M, tm)
    if Mp != M:                              # zero-pad tail rows, slice after
        xb = jnp.pad(xb, ((0, Mp - M), (0, 0)))

    # Grid: N tiles outer, M tiles inner -> the weight block index (0, j) is
    # constant across consecutive steps, so Pallas does not re-fetch it.
    out = pl.pallas_call(
        _linear_kernel,
        out_shape=jax.ShapeDtypeStruct((Mp, N), out_dtype),
        grid=(N // tn, Mp // tm),
        in_specs=[
            pl.BlockSpec((tm, K), lambda j, i: (i, 0)),
            pl.BlockSpec((K, tn), lambda j, i: (0, j)),
            pl.BlockSpec((1, tn), lambda j, i: (0, j)),
        ],
        out_specs=pl.BlockSpec((tm, tn), lambda j, i: (i, j)),
        compiler_params=pltpu.CompilerParams(
            dimension_semantics=("parallel", "parallel"),
            vmem_limit_bytes=vmem_limit),
    )(xb, wb, bb)
    return out[:M] if Mp != M else out


# ------------------------- depthwise 3x3 conv + GELU -------------------------

_SQRT_2_OVER_PI = 0.7978845608028654
_GELU_C = 0.044715


def _gelu_tanh(x):
    # tanh-form GELU (== jax.nn.gelu(approximate=True)); one EUP tanh and ~6
    # VALU ops/elem, keeping VALU slots free for the 9 depthwise MACs.
    # (Max abs deviation from torch's erf GELU ~3e-3, below bf16 resolution.)
    return 0.5 * x * (1.0 + jnp.tanh(_SQRT_2_OVER_PI * (x + _GELU_C * x * x * x)))


def _dwconv_gelu_kernel(x_ref, w_ref, b_ref, o_ref, xp_ref):
    # x_ref: (bt, H, W, tc) hidden activation (channels-last)
    # w_ref: (3, 3, tc) f32 depthwise taps; b_ref: (1, 1, tc) f32 bias
    # o_ref: (bt, H, W, tc) = GELU(dwconv3x3(x) + b)
    # xp_ref: (bt, H+2, W+2, tc) compute-dtype scratch (zero halo = padding=1)
    bt, Hp, Wp, tc = xp_ref.shape
    H, W = Hp - 2, Wp - 2
    cdt = xp_ref.dtype

    # Zero only the 1-wide halo border (cheap), then write the tile interior.
    xp_ref[:, 0:1, :, :] = jnp.zeros((bt, 1, Wp, tc), cdt)
    xp_ref[:, Hp - 1:Hp, :, :] = jnp.zeros((bt, 1, Wp, tc), cdt)
    xp_ref[:, :, 0:1, :] = jnp.zeros((bt, Hp, 1, tc), cdt)
    xp_ref[:, :, Wp - 1:Wp, :] = jnp.zeros((bt, Hp, 1, tc), cdt)
    xp_ref[:, 1:H + 1, 1:W + 1, :] = x_ref[...].astype(cdt)

    wt = w_ref[...].astype(cdt)                        # (3, 3, tc)
    acc = jnp.zeros((bt, H, W, tc), jnp.float32)       # f32 accumulator
    for dh in range(3):
        for dw in range(3):
            # 9 static slices of the single padded scratch (H shifts are free
            # outer-dim slices; W shifts are static sublane-offset loads).
            acc = acc + xp_ref[:, dh:dh + H, dw:dw + W, :] * wt[dh, dw]

    y = acc + b_ref[...]                               # f32 bias add
    o_ref[...] = _gelu_tanh(y).astype(o_ref.dtype)


def _pick_dwconv_tiles(BT, H, W, C, budget, compute_bytes, in_bytes, out_bytes):
    def est(bt, tc):
        tile = bt * H * W * tc
        padded = bt * (H + 2) * (W + 2) * tc
        return (2 * tile * in_bytes            # double-buffered input blocks
                + 2 * tile * out_bytes         # double-buffered output blocks
                + padded * compute_bytes       # halo-padded scratch
                + 2 * tile * 4)                # f32 accumulator + epilogue temp

    # Channel tiling keeps lanes dense and needs no halo (depthwise conv).
    tcs = [C]
    if C % 128 == 0 and C > 128:
        tcs += [t for t in (512, 256, 128) if t < C and C % t == 0]

    for tc in tcs:
        bt = 0
        for cand in range(BT, 0, -1):
            if BT % cand == 0 and est(cand, tc) <= budget:
                bt = cand
                break
        if bt == 0:
            continue
        # Keep at least 2 grid steps so the parallel axes can shard across
        # v7x's two TensorCores (irrelevant but harmless on v5e/v6e).
        if bt == BT and BT >= 2 and (C // tc) < 2:
            for cand in range(BT // 2, 0, -1):
                if BT % cand == 0:
                    bt = cand
                    break
        return bt, tc

    raise ValueError(
        f"dwconv_gelu(): a single (1, {H}, {W}, {min(tcs)}) tile exceeds the "
        f"VMEM budget ({budget} bytes). "
        "TODO(synk): add manual-DMA H-halo tiling for such feature maps.")


def dwconv_gelu(x, w, b, *, compute_dtype=None, out_dtype=jnp.bfloat16):
    """x: (B*T, H, W, C) channels-last. Returns GELU(dwconv3x3(x)+b)."""
    BT, H, W, C = x.shape
    if compute_dtype is None:
        compute_dtype = _default_conv_compute_dtype()
    budget, vmem_limit = _vmem_limits()
    bt, tc = _pick_dwconv_tiles(
        BT, H, W, C, budget,
        jnp.dtype(compute_dtype).itemsize,
        jnp.dtype(x.dtype).itemsize,
        jnp.dtype(out_dtype).itemsize)

    return pl.pallas_call(
        _dwconv_gelu_kernel,
        out_shape=jax.ShapeDtypeStruct((BT, H, W, C), out_dtype),
        grid=(C // tc, BT // bt),                  # image tiles innermost
        in_specs=[
            pl.BlockSpec((bt, H, W, tc), lambda c, i: (i, 0, 0, c)),
            pl.BlockSpec((3, 3, tc), lambda c, i: (0, 0, c)),
            pl.BlockSpec((1, 1, tc), lambda c, i: (0, 0, c)),
        ],
        out_specs=pl.BlockSpec((bt, H, W, tc), lambda c, i: (i, 0, 0, c)),
        scratch_shapes=[pltpu.VMEM((bt, H + 2, W + 2, tc), compute_dtype)],
        compiler_params=pltpu.CompilerParams(
            dimension_semantics=("parallel", "parallel"),
            vmem_limit_bytes=vmem_limit),
    )(x, w.astype(jnp.float32), b.reshape(1, 1, C).astype(jnp.float32))


# --------------------------------- Mlp module --------------------------------

def init_mlp_params(key, in_features, hidden_features=None, out_features=None):
    out_features = out_features or in_features
    hidden_features = hidden_features or in_features
    k1, k2, k3 = jax.random.split(key, 3)
    # Linear: trunc_normal_(std=0.02) -> synthetic normal(0, 0.02); bias 0
    w1 = 0.02 * jax.random.normal(k1, (in_features, hidden_features), jnp.float32)
    b1 = jnp.zeros((hidden_features,), jnp.float32)
    # Depthwise Conv2d(3x3, groups=dim): fan_out = 3*3*dim // dim = 9
    wdw = math.sqrt(2.0 / 9.0) * jax.random.normal(
        k2, (3, 3, hidden_features), jnp.float32)
    bdw = jnp.zeros((hidden_features,), jnp.float32)
    w2 = 0.02 * jax.random.normal(k3, (hidden_features, out_features), jnp.float32)
    b2 = jnp.zeros((out_features,), jnp.float32)
    return dict(w1=w1, b1=b1, wdw=wdw, bdw=bdw, w2=w2, b2=b2)


def mlp_forward(params, x, T, H, W, *, out_dtype=jnp.bfloat16, precise=False):
    """Mlp.forward with linear=False, drop=0.0.  x: (B, N, C), N = T*H*W.

    precise=True runs every stage in f32 (for tight parity checks); the default
    path uses bf16 matmul operands / stored activations and bf16 conv
    intermediates on v6e/v7x.
    """
    B, N, C_in = x.shape
    assert N == T * H * W
    hidden = params["w1"].shape[1]

    operand_dtype = jnp.float32 if precise else jnp.bfloat16
    hidden_store = jnp.float32 if precise else jnp.bfloat16
    conv_dtype = jnp.float32 if precise else None          # None -> per-chip default

    # fc1 (linear=False -> no ReLU)
    h = linear(x.reshape(B * N, C_in), params["w1"], params["b1"],
               out_dtype=hidden_store, operand_dtype=operand_dtype)
    # DWConv3x3 + GELU (fused), channels-last, N ordered (T, H, W)
    h = h.reshape(B * T, H, W, hidden)
    h = dwconv_gelu(h, params["wdw"], params["bdw"],
                    compute_dtype=conv_dtype, out_dtype=hidden_store)
    # dropout p=0.0 -> identity; fc2
    out = linear(h.reshape(B * N, hidden), params["w2"], params["b2"],
                 out_dtype=out_dtype, operand_dtype=operand_dtype)
    # TODO(synk): fuse dwconv+GELU as fc2's producer in a single pallas_call so
    # the wide hidden activation never round-trips HBM between the three calls.
    return out.reshape(B, N, -1)                            # dropout p=0.0 -> identity


# ------------------------------- pure-JAX reference --------------------------

def mlp_reference(params, x, T, H, W, *, approximate_gelu=False):
    B, N, C = x.shape
    hdot = partial(jnp.dot, precision=jax.lax.Precision.HIGHEST)
    h = hdot(x.reshape(B * N, C), params["w1"]) + params["b1"]
    hidden = h.shape[-1]
    h = h.reshape(B * T, H, W, hidden)
    hp = jnp.pad(h, ((0, 0), (1, 1), (1, 1), (0, 0)))
    acc = jnp.zeros_like(h)
    for dh in range(3):
        for dw in range(3):
            acc = acc + hp[:, dh:dh + H, dw:dw + W, :] * params["wdw"][dh, dw]
    g = jax.nn.gelu(acc + params["bdw"], approximate=approximate_gelu)
    out = hdot(g.reshape(B * N, hidden), params["w2"]) + params["b2"]
    return out.reshape(B, N, -1)


if __name__ == "__main__":
    # Small correctness shapes (production PVT dims should keep hidden % 128 == 0
    # for lane-dense blocks; these toy sizes exercise the full code path).
    B, T, H, W = 2, 2, 8, 8
    C_in, hidden, C_out = 16, 32, 16
    N = T * H * W

    key = jax.random.PRNGKey(0)
    kx, kp = jax.random.split(key)
    x = jax.random.normal(kx, (B, N, C_in), jnp.float32)
    params = init_mlp_params(kp, C_in, hidden, C_out)

    # Fast (bf16) path: loose check vs the erf-GELU torch-parity reference.
    fwd = jax.jit(lambda p, v: mlp_forward(p, v, T, H, W))
    y = jax.block_until_ready(fwd(params, x))
    assert y.shape == (B, N, C_out)
    assert bool(jnp.all(jnp.isfinite(y.astype(jnp.float32))))

    y_ref = mlp_reference(params, x, T, H, W, approximate_gelu=False)
    scale = float(jnp.max(jnp.abs(y_ref)))
    err = float(jnp.max(jnp.abs(y.astype(jnp.float32) - y_ref)))
    assert err <= 0.1 * scale + 3e-4, ("bf16 path mismatch", err, scale)

    # Tight f32 path: catches tap-offset / indexing / tiling bugs.
    fwd32 = jax.jit(lambda p, v: mlp_forward(p, v, T, H, W,
                                             out_dtype=jnp.float32, precise=True))
    y32 = jax.block_until_ready(fwd32(params, x))
    y_ref_t = mlp_reference(params, x, T, H, W, approximate_gelu=True)
    scale_t = float(jnp.max(jnp.abs(y_ref_t)))
    err_t = float(jnp.max(jnp.abs(y32 - y_ref_t)))
    assert err_t <= 2e-3 * scale_t + 1e-6, ("f32 path mismatch", err_t, scale_t)

    print("KERNEL_OK")
</pallas_src>

<mosaic_0001>
module attributes {stable_mosaic.version = 11 : i64} {
  func.func @_linear_kernel(%arg0: i32, %arg1: i32, %arg2: memref<256x16xbf16, #tpu.memory_space<vmem>>, %arg3: memref<16x32xbf16, #tpu.memory_space<vmem>>, %arg4: memref<1x32xf32, #tpu.memory_space<vmem>>, %arg5: memref<256x32xbf16, #tpu.memory_space<vmem>>) attributes {dimension_semantics = [#tpu.dimension_semantics<parallel>, #tpu.dimension_semantics<parallel>], iteration_bounds = array<i64: 1, 1>, scalar_prefetch = 0 : i64, scratch_operands = 0 : i64, tpu.core_type = #tpu.core_type<tc>, window_params = [{transform_indices = @transform_0, window_bounds = array<i64: 256, 16>}, {transform_indices = @transform_1, window_bounds = array<i64: 16, 32>}, {transform_indices = @transform_2, window_bounds = array<i64: 1, 32>}, {transform_indices = @transform_3, window_bounds = array<i64: 256, 32>}]} {
    %c0 = arith.constant 0 : index
    %c0_0 = arith.constant 0 : index
    %0 = vector.load %arg2[%c0, %c0_0] : memref<256x16xbf16, #tpu.memory_space<vmem>>, vector<256x16xbf16>
    %c0_1 = arith.constant 0 : index
    %c0_2 = arith.constant 0 : index
    %1 = vector.load %arg3[%c0_1, %c0_2] : memref<16x32xbf16, #tpu.memory_space<vmem>>, vector<16x32xbf16>
    %cst = arith.constant dense<0.000000e+00> : vector<256x32xf32>
    %2 = tpu.matmul %0, %1, %cst {dimension_numbers = #tpu.dot_dimension_numbers<[1], [0], [0], [1], [0, 0, 1, 1], [], []>} : vector<256x16xbf16>, vector<16x32xbf16>, vector<256x32xf32> -> vector<256x32xf32>
    %c0_3 = arith.constant 0 : index
    %c0_4 = arith.constant 0 : index
    %3 = vector.load %arg4[%c0_3, %c0_4] : memref<1x32xf32, #tpu.memory_space<vmem>>, vector<1x32xf32>
    %4 = vector.broadcast %3 : vector<1x32xf32> to vector<256x32xf32>
    %5 = arith.addf %2, %4 : vector<256x32xf32>
    %6 = arith.truncf %5 : vector<256x32xf32> to vector<256x32xbf16>
    %c0_5 = arith.constant 0 : index
    %c0_6 = arith.constant 0 : index
    %7 = vector.load %arg5[%c0_5, %c0_6] : memref<256x32xbf16, #tpu.memory_space<vmem>>, vector<256x32xbf16>
    tpu.vector_store %arg5[%c0_5, %c0_6], %6 {strides = array<i32>} : memref<256x32xbf16, #tpu.memory_space<vmem>>, vector<256x32xbf16>,
    return
  }
  func.func @transform_0(%arg0: i32, %arg1: i32) -> (i32, i32) {
    %c0_i32 = arith.constant 0 : i32
    %c0_i32_0 = arith.constant 0 : i32
    return %arg1, %c0_i32 : i32, i32
  }
  func.func @transform_1(%arg0: i32, %arg1: i32) -> (i32, i32) {
    %c0_i32 = arith.constant 0 : i32
    %c0_i32_0 = arith.constant 0 : i32
    return %c0_i32, %arg0 : i32, i32
  }
  func.func @transform_2(%arg0: i32, %arg1: i32) -> (i32, i32) {
    %c0_i32 = arith.constant 0 : i32
    %c0_i32_0 = arith.constant 0 : i32
    return %c0_i32, %arg0 : i32, i32
  }
  func.func @transform_3(%arg0: i32, %arg1: i32) -> (i32, i32) {
    %c0_i32 = arith.constant 0 : i32
    return %arg1, %arg0 : i32, i32
  }
}

module attributes {stable_mosaic.version = 11 : i64} {
  func.func @_dwconv_gelu_kernel(%arg0: i32, %arg1: i32, %arg2: memref<2x8x8x32xbf16, #tpu.memory_space<vmem>>, %arg3: memref<3x3x32xf32, #tpu.memory_space<vmem>>, %arg4: memref<1x1x32xf32, #tpu.memory_space<vmem>>, %arg5: memref<2x8x8x32xbf16, #tpu.memory_space<vmem>>, %arg6: memref<2x10x10x32xf32, #tpu.memory_space<vmem>>) attributes {dimension_semantics = [#tpu.dimension_semantics<parallel>, #tpu.dimension_semantics<parallel>], iteration_bounds = array<i64: 1, 2>, scalar_prefetch = 0 : i64, scratch_operands = 1 : i64, tpu.core_type = #tpu.core_type<tc>, window_params = [{transform_indices = @transform_0, window_bounds = array<i64: 2, 8, 8, 32>}, {transform_indices = @transform_1, window_bounds = array<i64: 3, 3, 32>}, {transform_indices = @transform_2, window_bounds = array<i64: 1, 1, 32>}, {transform_indices = @transform_3, window_bounds = array<i64: 2, 8, 8, 32>}]} {
    %cst = arith.constant 0.000000e+00 : f32
    %0 = vector.broadcast %cst : f32 to vector<2x1x10x32xf32>
    %c0 = arith.constant 0 : index
    %c0_0 = arith.constant 0 : index
    %c0_1 = arith.constant 0 : index
    %c0_2 = arith.constant 0 : index
    %1 = vector.load %arg6[%c0, %c0_0, %c0_1, %c0_2] : memref<2x10x10x32xf32, #tpu.memory_space<vmem>>, vector<2x1x10x32xf32>
    tpu.vector_store %arg6[%c0, %c0_0, %c0_1, %c0_2], %0 {strides = array<i32>} : memref<2x10x10x32xf32, #tpu.memory_space<vmem>>, vector<2x1x10x32xf32>,
    %cst_3 = arith.constant 0.000000e+00 : f32
    %2 = vector.broadcast %cst_3 : f32 to vector<2x1x10x32xf32>
    %c0_4 = arith.constant 0 : index
    %c9 = arith.constant 9 : index
    %c0_5 = arith.constant 0 : index
    %c0_6 = arith.constant 0 : index
    %3 = vector.load %arg6[%c0_4, %c9, %c0_5, %c0_6] : memref<2x10x10x32xf32, #tpu.memory_space<vmem>>, vector<2x1x10x32xf32>
    tpu.vector_store %arg6[%c0_4, %c9, %c0_5, %c0_6], %2 {strides = array<i32>} : memref<2x10x10x32xf32, #tpu.memory_space<vmem>>, vector<2x1x10x32xf32>,
    %cst_7 = arith.constant 0.000000e+00 : f32
    %4 = vector.broadcast %cst_7 : f32 to vector<2x10x1x32xf32>
    %c0_8 = arith.constant 0 : index
    %c0_9 = arith.constant 0 : index
    %c0_10 = arith.constant 0 : index
    %c0_11 = arith.constant 0 : index
    %5 = vector.load %arg6[%c0_8, %c0_9, %c0_10, %c0_11] : memref<2x10x10x32xf32, #tpu.memory_space<vmem>>, vector<2x10x1x32xf32>
    tpu.vector_store %arg6[%c0_8, %c0_9, %c0_10, %c0_11], %4 {strides = array<i32>} : memref<2x10x10x32xf32, #tpu.memory_space<vmem>>, vector<2x10x1x32xf32>,
    %cst_12 = arith.constant 0.000000e+00 : f32
    %6 = vector.broadcast %cst_12 : f32 to vector<2x10x1x32xf32>
    %c0_13 = arith.constant 0 : index
    %c0_14 = arith.constant 0 : index
    %c9_15 = arith.constant 9 : index
    %c0_16 = arith.constant 0 : index
    %7 = vector.load %arg6[%c0_13, %c0_14, %c9_15, %c0_16] : memref<2x10x10x32xf32, #tpu.memory_space<vmem>>, vector<2x10x1x32xf32>
    tpu.vector_store %arg6[%c0_13, %c0_14, %c9_15, %c0_16], %6 {strides = array<i32>} : memref<2x10x10x32xf32, #tpu.memory_space<vmem>>, vector<2x10x1x32xf32>,
    %c0_17 = arith.constant 0 : index
    %c0_18 = arith.constant 0 : index
    %c0_19 = arith.constant 0 : index
    %c0_20 = arith.constant 0 : index
    %8 = vector.load %arg2[%c0_17, %c0_18, %c0_19, %c0_20] : memref<2x8x8x32xbf16, #tpu.memory_space<vmem>>, vector<2x8x8x32xbf16>
    %9 = arith.extf %8 : vector<2x8x8x32xbf16> to vector<2x8x8x32xf32>
    %c0_21 = arith.constant 0 : index
    %c1 = arith.constant 1 : index
    %c1_22 = arith.constant 1 : index
    %c0_23 = arith.constant 0 : index
    %10 = vector.load %arg6[%c0_21, %c1, %c1_22, %c0_23] : memref<2x10x10x32xf32, #tpu.memory_space<vmem>>, vector<2x8x8x32xf32>
    tpu.vector_store %arg6[%c0_21, %c1, %c1_22, %c0_23], %9 {strides = array<i32>} : memref<2x10x10x32xf32, #tpu.memory_space<vmem>>, vector<2x8x8x32xf32>,
    %c0_24 = arith.constant 0 : index
    %c0_25 = arith.constant 0 : index
    %c0_26 = arith.constant 0 : index
    %11 = vector.load %arg3[%c0_24, %c0_25, %c0_26] : memref<3x3x32xf32, #tpu.memory_space<vmem>>, vector<3x3x32xf32>
    %cst_27 = arith.constant 0.000000e+00 : f32
    %12 = vector.broadcast %cst_27 : f32 to vector<2x8x8x32xf32>
    %c0_28 = arith.constant 0 : index
    %c0_29 = arith.constant 0 : index
    %c0_30 = arith.constant 0 : index
    %c0_31 = arith.constant 0 : index
    %13 = vector.load %arg6[%c0_28, %c0_29, %c0_30, %c0_31] : memref<2x10x10x32xf32, #tpu.memory_space<vmem>>, vector<2x8x8x32xf32>
    %14 = vector.extract_strided_slice %11 {offsets = [0, 0, 0], sizes = [1, 1, 32], strides = [1, 1, 1]} : vector<3x3x32xf32> to vector<1x1x32xf32>
    %15 = vector.shape_cast %14 : vector<1x1x32xf32> to vector<32xf32>
    %16 = vector.shape_cast %15 : vector<32xf32> to vector<1x1x1x32xf32>
    %17 = vector.broadcast %16 : vector<1x1x1x32xf32> to vector<2x8x8x32xf32>
    %18 = arith.mulf %13, %17 : vector<2x8x8x32xf32>
    %19 = arith.addf %12, %18 : vector<2x8x8x32xf32>
    %c0_32 = arith.constant 0 : index
    %c0_33 = arith.constant 0 : index
    %c1_34 = arith.constant 1 : index
    %c0_35 = arith.constant 0 : index
    %20 = vector.load %arg6[%c0_32, %c0_33, %c1_34, %c0_35] : memref<2x10x10x32xf32, #tpu.memory_space<vmem>>, vector<2x8x8x32xf32>
    %21 = vector.extract_strided_slice %11 {offsets = [0, 1, 0], sizes = [1, 1, 32], strides = [1, 1, 1]} : vector<3x3x32xf32> to vector<1x1x32xf32>
    %22 = vector.shape_cast %21 : vector<1x1x32xf32> to vector<32xf32>
    %23 = vector.shape_cast %22 : vector<32xf32> to vector<1x1x1x32xf32>
    %24 = vector.broadcast %23 : vector<1x1x1x32xf32> to vector<2x8x8x32xf32>
    %25 = arith.mulf %20, %24 : vector<2x8x8x32xf32>
    %26 = arith.addf %19, %25 : vector<2x8x8x32xf32>
    %c0_36 = arith.constant 0 : index
    %c0_37 = arith.constant 0 : index
    %c2 = arith.constant 2 : index
    %c0_38 = arith.constant 0 : index
    %27 = vector.load %arg6[%c0_36, %c0_37, %c2, %c0_38] : memref<2x10x10x32xf32, #tpu.memory_space<vmem>>, vector<2x8x8x32xf32>
    %28 = vector.extract_strided_slice %11 {offsets = [0, 2, 0], sizes = [1, 1, 32], strides = [1, 1, 1]} : vector<3x3x32xf32> to vector<1x1x32xf32>
    %29 = vector.shape_cast %28 : vector<1x1x32xf32> to vector<32xf32>
    %30 = vector.shape_cast %29 : vector<32xf32> to vector<1x1x1x32xf32>
    %31 = vector.broadcast %30 : vector<1x1x1x32xf32> to vector<2x8x8x32xf32>
    %32 = arith.mulf %27, %31 : vector<2x8x8x32xf32>
    %33 = arith.addf %26, %32 : vector<2x8x8x32xf32>
    %c0_39 = arith.constant 0 : index
    %c1_40 = arith.constant 1 : index
    %c0_41 = arith.constant 0 : index
    %c0_42 = arith.constant 0 : index
    %34 = vector.load %arg6[%c0_39, %c1_40, %c0_41, %c0_42] : memref<2x10x10x32xf32, #tpu.memory_space<vmem>>, vector<2x8x8x32xf32>
    %35 = vector.extract_strided_slice %11 {offsets = [1, 0, 0], sizes = [1, 1, 32], strides = [1, 1, 1]} : vector<3x3x32xf32> to vector<1x1x32xf32>
    %36 = vector.shape_cast %35 : vector<1x1x32xf32> to vector<32xf32>
    %37 = vector.shape_cast %36 : vector<32xf32> to vector<1x1x1x32xf32>
    %38 = vector.broadcast %37 : vector<1x1x1x32xf32> to vector<2x8x8x32xf32>
    %39 = arith.mulf %34, %38 : vector<2x8x8x32xf32>
    %40 = arith.addf %33, %39 : vector<2x8x8x32xf32>
    %c0_43 = arith.constant 0 : index
    %c1_44 = arith.constant 1 : index
    %c1_45 = arith.constant 1 : index
    %c0_46 = arith.constant 0 : index
    %41 = vector.load %arg6[%c0_43, %c1_44, %c1_45, %c0_46] : memref<2x10x10x32xf32, #tpu.memory_space<vmem>>, vector<2x8x8x32xf32>
    %42 = vector.extract_strided_slice %11 {offsets = [1, 1, 0], sizes = [1, 1, 32], strides = [1, 1, 1]} : vector<3x3x32xf32> to vector<1x1x32xf32>
    %43 = vector.shape_cast %42 : vector<1x1x32xf32> to vector<32xf32>
    %44 = vector.shape_cast %43 : vector<32xf32> to vector<1x1x1x32xf32>
    %45 = vector.broadcast %44 : vector<1x1x1x32xf32> to vector<2x8x8x32xf32>
    %46 = arith.mulf %41, %45 : vector<2x8x8x32xf32>
    %47 = arith.addf %40, %46 : vector<2x8x8x32xf32>
    %c0_47 = arith.constant 0 : index
    %c1_48 = arith.constant 1 : index
    %c2_49 = arith.constant 2 : index
    %c0_50 = arith.constant 0 : index
    %48 = vector.load %arg6[%c0_47, %c1_48, %c2_49, %c0_50] : memref<2x10x10x32xf32, #tpu.memory_space<vmem>>, vector<2x8x8x32xf32>
    %49 = vector.extract_strided_slice %11 {offsets = [1, 2, 0], sizes = [1, 1, 32], strides = [1, 1, 1]} : vector<3x3x32xf32> to vector<1x1x32xf32>
    %50 = vector.shape_cast %49 : vector<1x1x32xf32> to vector<32xf32>
    %51 = vector.shape_cast %50 : vector<32xf32> to vector<1x1x1x32xf32>
    %52 = vector.broadcast %51 : vector<1x1x1x32xf32> to vector<2x8x8x32xf32>
    %53 = arith.mulf %48, %52 : vector<2x8x8x32xf32>
    %54 = arith.addf %47, %53 : vector<2x8x8x32xf32>
    %c0_51 = arith.constant 0 : index
    %c2_52 = arith.constant 2 : index
    %c0_53 = arith.constant 0 : index
    %c0_54 = arith.constant 0 : index
    %55 = vector.load %arg6[%c0_51, %c2_52, %c0_53, %c0_54] : memref<2x10x10x32xf32, #tpu.memory_space<vmem>>, vector<2x8x8x32xf32>
    %56 = vector.extract_strided_slice %11 {offsets = [2, 0, 0], sizes = [1, 1, 32], strides = [1, 1, 1]} : vector<3x3x32xf32> to vector<1x1x32xf32>
    %57 = vector.shape_cast %56 : vector<1x1x32xf32> to vector<32xf32>
    %58 = vector.shape_cast %57 : vector<32xf32> to vector<1x1x1x32xf32>
    %59 = vector.broadcast %58 : vector<1x1x1x32xf32> to vector<2x8x8x32xf32>
    %60 = arith.mulf %55, %59 : vector<2x8x8x32xf32>
    %61 = arith.addf %54, %60 : vector<2x8x8x32xf32>
    %c0_55 = arith.constant 0 : index
    %c2_56 = arith.constant 2 : index
    %c1_57 = arith.constant 1 : index
    %c0_58 = arith.constant 0 : index
    %62 = vector.load %arg6[%c0_55, %c2_56, %c1_57, %c0_58] : memref<2x10x10x32xf32, #tpu.memory_space<vmem>>, vector<2x8x8x32xf32>
    %63 = vector.extract_strided_slice %11 {offsets = [2, 1, 0], sizes = [1, 1, 32], strides = [1, 1, 1]} : vector<3x3x32xf32> to vector<1x1x32xf32>
    %64 = vector.shape_cast %63 : vector<1x1x32xf32> to vector<32xf32>
    %65 = vector.shape_cast %64 : vector<32xf32> to vector<1x1x1x32xf32>
    %66 = vector.broadcast %65 : vector<1x1x1x32xf32> to vector<2x8x8x32xf32>
    %67 = arith.mulf %62, %66 : vector<2x8x8x32xf32>
    %68 = arith.addf %61, %67 : vector<2x8x8x32xf32>
    %c0_59 = arith.constant 0 : index
    %c2_60 = arith.constant 2 : index
    %c2_61 = arith.constant 2 : index
    %c0_62 = arith.constant 0 : index
    %69 = vector.load %arg6[%c0_59, %c2_60, %c2_61, %c0_62] : memref<2x10x10x32xf32, #tpu.memory_space<vmem>>, vector<2x8x8x32xf32>
    %70 = vector.extract_strided_slice %11 {offsets = [2, 2, 0], sizes = [1, 1, 32], strides = [1, 1, 1]} : vector<3x3x32xf32> to vector<1x1x32xf32>
    %71 = vector.shape_cast %70 : vector<1x1x32xf32> to vector<32xf32>
    %72 = vector.shape_cast %71 : vector<32xf32> to vector<1x1x1x32xf32>
    %73 = vector.broadcast %72 : vector<1x1x1x32xf32> to vector<2x8x8x32xf32>
    %74 = arith.mulf %69, %73 : vector<2x8x8x32xf32>
    %75 = arith.addf %68, %74 : vector<2x8x8x32xf32>
    %c0_63 = arith.constant 0 : index
    %c0_64 = arith.constant 0 : index
    %c0_65 = arith.constant 0 : index
    %76 = vector.load %arg4[%c0_63, %c0_64, %c0_65] : memref<1x1x32xf32, #tpu.memory_space<vmem>>, vector<1x1x32xf32>
    %77 = vector.shape_cast %76 : vector<1x1x32xf32> to vector<1x1x1x32xf32>
    %78 = vector.broadcast %77 : vector<1x1x1x32xf32> to vector<2x8x8x32xf32>
    %79 = arith.addf %75, %78 : vector<2x8x8x32xf32>
    %cst_66 = arith.constant 5.000000e-01 : f32
    %80 = vector.broadcast %cst_66 : f32 to vector<2x8x8x32xf32>
    %81 = arith.mulf %80, %79 : vector<2x8x8x32xf32>
    %cst_67 = arith.constant 4.471500e-02 : f32
    %82 = vector.broadcast %cst_67 : f32 to vector<2x8x8x32xf32>
    %83 = arith.mulf %82, %79 : vector<2x8x8x32xf32>
    %84 = arith.mulf %83, %79 : vector<2x8x8x32xf32>
    %85 = arith.mulf %84, %79 : vector<2x8x8x32xf32>
    %86 = arith.addf %79, %85 : vector<2x8x8x32xf32>
    %cst_68 = arith.constant 0.797884583 : f32
    %87 = vector.broadcast %cst_68 : f32 to vector<2x8x8x32xf32>
    %88 = arith.mulf %87, %86 : vector<2x8x8x32xf32>
    %89 = math.tanh %88 : vector<2x8x8x32xf32>
    %cst_69 = arith.constant 1.000000e+00 : f32
    %90 = vector.broadcast %cst_69 : f32 to vector<2x8x8x32xf32>
    %91 = arith.addf %90, %89 : vector<2x8x8x32xf32>
    %92 = arith.mulf %81, %91 : vector<2x8x8x32xf32>
    %93 = arith.truncf %92 : vector<2x8x8x32xf32> to vector<2x8x8x32xbf16>
    %c0_70 = arith.constant 0 : index
    %c0_71 = arith.constant 0 : index
    %c0_72 = arith.constant 0 : index
    %c0_73 = arith.constant 0 : index
    %94 = vector.load %arg5[%c0_70, %c0_71, %c0_72, %c0_73] : memref<2x8x8x32xbf16, #tpu.memory_space<vmem>>, vector<2x8x8x32xbf16>
    tpu.vector_store %arg5[%c0_70, %c0_71, %c0_72, %c0_73], %93 {strides = array<i32>} : memref<2x8x8x32xbf16, #tpu.memory_space<vmem>>, vector<2x8x8x32xbf16>,
    return
  }
  func.func @transform_0(%arg0: i32, %arg1: i32) -> (i32, i32, i32, i32) {
    %c0_i32 = arith.constant 0 : i32
    %c0_i32_0 = arith.constant 0 : i32
    %c0_i32_1 = arith.constant 0 : i32
    return %arg1, %c0_i32, %c0_i32_0, %arg0 : i32, i32, i32, i32
  }
  func.func @transform_1(%arg0: i32, %arg1: i32) -> (i32, i32, i32) {
    %c0_i32 = arith.constant 0 : i32
    %c0_i32_0 = arith.constant 0 : i32
    %c0_i32_1 = arith.constant 0 : i32
    return %c0_i32, %c0_i32_0, %arg0 : i32, i32, i32
  }
  func.func @transform_2(%arg0: i32, %arg1: i32) -> (i32, i32, i32) {
    %c0_i32 = arith.constant 0 : i32
    %c0_i32_0 = arith.constant 0 : i32
    %c0_i32_1 = arith.constant 0 : i32
    return %c0_i32, %c0_i32_0, %arg0 : i32, i32, i32
  }
  func.func @transform_3(%arg0: i32, %arg1: i32) -> (i32, i32, i32, i32) {
    %c0_i32 = arith.constant 0 : i32
    %c0_i32_0 = arith.constant 0 : i32
    %c0_i32_1 = arith.constant 0 : i32
    return %arg1, %c0_i32, %c0_i32_0, %arg0 : i32, i32, i32, i32
  }
}

module attributes {stable_mosaic.version = 11 : i64} {
  func.func @_linear_kernel(%arg0: i32, %arg1: i32, %arg2: memref<256x32xbf16, #tpu.memory_space<vmem>>, %arg3: memref<32x16xbf16, #tpu.memory_space<vmem>>, %arg4: memref<1x16xf32, #tpu.memory_space<vmem>>, %arg5: memref<256x16xbf16, #tpu.memory_space<vmem>>) attributes {dimension_semantics = [#tpu.dimension_semantics<parallel>, #tpu.dimension_semantics<parallel>], iteration_bounds = array<i64: 1, 1>, scalar_prefetch = 0 : i64, scratch_operands = 0 : i64, tpu.core_type = #tpu.core_type<tc>, window_params = [{transform_indices = @transform_0, window_bounds = array<i64: 256, 32>}, {transform_indices = @transform_1, window_bounds = array<i64: 32, 16>}, {transform_indices = @transform_2, window_bounds = array<i64: 1, 16>}, {transform_indices = @transform_3, window_bounds = array<i64: 256, 16>}]} {
    %c0 = arith.constant 0 : index
    %c0_0 = arith.constant 0 : index
    %0 = vector.load %arg2[%c0, %c0_0] : memref<256x32xbf16, #tpu.memory_space<vmem>>, vector<256x32xbf16>
    %c0_1 = arith.constant 0 : index
    %c0_2 = arith.constant 0 : index
    %1 = vector.load %arg3[%c0_1, %c0_2] : memref<32x16xbf16, #tpu.memory_space<vmem>>, vector<32x16xbf16>
    %cst = arith.constant dense<0.000000e+00> : vector<256x16xf32>
    %2 = tpu.matmul %0, %1, %cst {dimension_numbers = #tpu.dot_dimension_numbers<[1], [0], [0], [1], [0, 0, 1, 1], [], []>} : vector<256x32xbf16>, vector<32x16xbf16>, vector<256x16xf32> -> vector<256x16xf32>
    %c0_3 = arith.constant 0 : index
    %c0_4 = arith.constant 0 : index
    %3 = vector.load %arg4[%c0_3, %c0_4] : memref<1x16xf32, #tpu.memory_space<vmem>>, vector<1x16xf32>
    %4 = vector.broadcast %3 : vector<1x16xf32> to vector<256x16xf32>
    %5 = arith.addf %2, %4 : vector<256x16xf32>
    %6 = arith.truncf %5 : vector<256x16xf32> to vector<256x16xbf16>
    %c0_5 = arith.constant 0 : index
    %c0_6 = arith.constant 0 : index
    %7 = vector.load %arg5[%c0_5, %c0_6] : memref<256x16xbf16, #tpu.memory_space<vmem>>, vector<256x16xbf16>
    tpu.vector_store %arg5[%c0_5, %c0_6], %6 {strides = array<i32>} : memref<256x16xbf16, #tpu.memory_space<vmem>>, vector<256x16xbf16>,
    return
  }
  func.func @transform_0(%arg0: i32, %arg1: i32) -> (i32, i32) {
    %c0_i32 = arith.constant 0 : i32
    %c0_i32_0 = arith.constant 0 : i32
    return %arg1, %c0_i32 : i32, i32
  }
  func.func @transform_1(%arg0: i32, %arg1: i32) -> (i32, i32) {
    %c0_i32 = arith.constant 0 : i32
    %c0_i32_0 = arith.constant 0 : i32
    return %c0_i32, %arg0 : i32, i32
  }
  func.func @transform_2(%arg0: i32, %arg1: i32) -> (i32, i32) {
    %c0_i32 = arith.constant 0 : i32
    %c0_i32_0 = arith.constant 0 : i32
    return %c0_i32, %arg0 : i32, i32
  }
  func.func @transform_3(%arg0: i32, %arg1: i32) -> (i32, i32) {
    %c0_i32 = arith.constant 0 : i32
    return %arg1, %arg0 : i32, i32
  }
}

</mosaic_0001>

<bundles_post_ra>
// kernel: _lambda_.5
= control target key start
LH: loop header
LB: loop body
LE: loop exit
PB: predicated region body
PF: predicated region fallthrough
CT: control target
= control target key end

     0   :  { %vm147_vm0 = vcmask 261120   ;;  %vm317_vm1 = vcmask 125952   ;;  %s722_s1 = inlined_call_operand.vmem [shape: bf16[32,16], index: 1, kind: input, shape index: {}]   ;;  %s723_s0 = inlined_call_operand.vmem [shape: bf16[256,32], index: 0, kind: input, shape index: {}]   ;;  %s724_s2 = inlined_call_operand.vmem [shape: f32[1,16], index: 2, kind: input, shape index: {}]   ;;  %s725_s3 = inlined_call_operand.vmem [shape: bf16[256,16], index: 3, kind: output, shape index: {}]  }
   0x1   :  { %v459_v0 = vld [vmem:[%s722_s1 + $0x8] sm:$0xff]  ;;  %v458_v1 = vld [vmem:[%s722_s1] sm:$0xff]  ;;  %v444_v10 = vld [vmem:[%s723_s0 + $0x10] sm:$0xff] }
   0x2   :  { %202 = vmatpush.bf16.msra.mxu0 %v459_v0  ;;  %460 = vmatpush.bf16.msra.mxu1 %v459_v0  ;;  %v442_v2 = vld [vmem:[%s723_s0] sm:$0xff]  ;;  %v443_v6 = vld [vmem:[%s723_s0 + $0x8] sm:$0xff]  ;;  %v448_v11 = vld [vmem:[%s723_s0 + $0x30] sm:$0xff] }
   0x3   :  { %461 = vmatpush.bf16.msra.mxu2 %v459_v0  ;;  %462 = vmatpush.bf16.msra.mxu3 %v459_v0  ;;  %v446_v3 = vld [vmem:[%s723_s0 + $0x20] sm:$0xff]  ;;  %v447_v7 = vld [vmem:[%s723_s0 + $0x28] sm:$0xff]  ;;  %v452_v12 = vld [vmem:[%s723_s0 + $0x50] sm:$0xff] }
   0x4   :  { %v450_v4 = vld [vmem:[%s723_s0 + $0x40] sm:$0xff]  ;;  %v451_v8 = vld [vmem:[%s723_s0 + $0x48] sm:$0xff]  ;;  %v456_v13 = vld [vmem:[%s723_s0 + $0x70] sm:$0xff] }
   0x5   :  { %v454_v5 = vld [vmem:[%s723_s0 + $0x60] sm:$0xff]  ;;  %v455_v9 = vld [vmem:[%s723_s0 + $0x68] sm:$0xff]  ;;  %v445_v14 = vld [vmem:[%s723_s0 + $0x18] sm:$0xff] }
   0x6   :  { %203 = vmatpush.bf16.msra.mxu0 %v458_v1  ;;  %463 = vmatpush.bf16.msra.mxu1 %v458_v1  ;;  %v449_v15 = vld [vmem:[%s723_s0 + $0x38] sm:$0xff]  ;;  %v560_v18 = vld [vmem:[%s724_s2] ss:$0 sm:$0xff] }
   0x7   :  { %464 = vmatpush.bf16.msra.mxu2 %v458_v1  ;;  %465 = vmatpush.bf16.msra.mxu3 %v458_v1  ;;  %v453_v16 = vld [vmem:[%s723_s0 + $0x58] sm:$0xff] }
   0x8   :  { %v457_v17 = vld [vmem:[%s723_s0 + $0x78] sm:$0xff] }
   0x9   :  { %426 = vmatmul.msk.bf16.vlgmr.msra.gmra.mxu0 %vm147_vm0, %v442_v2  ;;  %430 = vmatmul.msk.bf16.vlgmr.msra.gmra.mxu1 %vm147_vm0, %v446_v3 }
   0xa   :  { %434 = vmatmul.msk.bf16.vlgmr.msra.gmra.mxu2 %vm147_vm0, %v450_v4  ;;  %438 = vmatmul.msk.bf16.vlgmr.msra.gmra.mxu3 %vm147_vm0, %v454_v5 }
  0x19   :  { %427 = vmatmul.msk.bf16.gmra.mxu0 %vm147_vm0, %v443_v6  ;;  %431 = vmatmul.msk.bf16.gmra.mxu1 %vm147_vm0, %v447_v7 }
  0x1a   :  { %435 = vmatmul.msk.bf16.gmra.mxu2 %vm147_vm0, %v451_v8  ;;  %439 = vmatmul.msk.bf16.gmra.mxu3 %vm147_vm0, %v455_v9 }
  0x29   :  { %428 = vmatmul.msk.bf16.gmra.mxu0 %vm147_vm0, %v444_v10  ;;  %432 = vmatmul.msk.bf16.gmra.mxu1 %vm147_vm0, %v448_v11 }
  0x2a   :  { %436 = vmatmul.msk.bf16.gmra.mxu2 %vm147_vm0, %v452_v12  ;;  %440 = vmatmul.msk.bf16.gmra.mxu3 %vm147_vm0, %v456_v13 }
  0x39   :  { %429 = vmatmul.msk.bf16.gmra.mxu0 %vm147_vm0, %v445_v14  ;;  %433 = vmatmul.msk.bf16.gmra.mxu1 %vm147_vm0, %v449_v15 }
  0x3a   :  { %437 = vmatmul.msk.bf16.gmra.mxu2 %vm147_vm0, %v453_v16  ;;  %441 = vmatmul.msk.bf16.gmra.mxu3 %vm147_vm0, %v457_v17 }
  0x86   :  { %v205_v19 = vpop.f32.mrf.mxu0  ;;  %v225_v20 = vpop.f32.mrf.mxu1 }
  0x87   :  { %v206_v21 = vadd.f32 %v560_v18, %v205_v19  ;;  %v226_v22 = vadd.f32 %v560_v18, %v225_v20 }
  0x89   :  { %v285_v23 = vpack.c.bf16 %v206_v21, %v206_v21  ;;  %v293_v24 = vpack.c.bf16 %v226_v22, %v226_v22 }
  0x8b   :  { %318 = vst.msk [vmem:[%s725_s3] sm:$0xf] %vm317_vm1, %v285_v23 }
  0x8c   :  { %326 = vst.msk [vmem:[%s725_s3 + $0x20] sm:$0xf] %vm317_vm1, %v293_v24 }
  0x8d   :  { %v245_v25 = vpop.f32.mrf.mxu2  ;;  %v265_v26 = vpop.f32.mrf.mxu3 }
  0x8e   :  { %v246_v27 = vadd.f32 %v560_v18, %v245_v25  ;;  %v266_v28 = vadd.f32 %v560_v18, %v265_v26  ;;  %v207_v29 = vpop.f32.mrf.mxu0  ;;  %v227_v30 = vpop.f32.mrf.mxu1 }
  0x8f   :  { %v208_v31 = vadd.f32 %v560_v18, %v207_v29  ;;  %v228_v32 = vadd.f32 %v560_v18, %v227_v30 }
  0x90   :  { %v301_v33 = vpack.c.bf16 %v246_v27, %v246_v27  ;;  %v309_v34 = vpack.c.bf16 %v266_v28, %v266_v28 }
  0x91   :  { %v286_v35 = vpack.c.bf16 %v208_v31, %v208_v31  ;;  %v294_v36 = vpack.c.bf16 %v228_v32, %v228_v32 }
  0x92   :  { %334 = vst.msk [vmem:[%s725_s3 + $0x40] sm:$0xf] %vm317_vm1, %v301_v33 }
  0x93   :  { %342 = vst.msk [vmem:[%s725_s3 + $0x60] sm:$0xf] %vm317_vm1, %v309_v34 }
  0x94   :  { %319 = vst.msk [vmem:[%s725_s3 + $0x4] sm:$0xf] %vm317_vm1, %v286_v35 }
  0x95   :  { %327 = vst.msk [vmem:[%s725_s3 + $0x24] sm:$0xf] %vm317_vm1, %v294_v36  ;;  %v247_v37 = vpop.f32.mrf.mxu2  ;;  %v267_v38 = vpop.f32.mrf.mxu3 }
  0x96   :  { %v248_v39 = vadd.f32 %v560_v18, %v247_v37  ;;  %v268_v40 = vadd.f32 %v560_v18, %v267_v38  ;;  %v210_v41 = vpop.f32.mrf.mxu0  ;;  %v230_v42 = vpop.f32.mrf.mxu1 }
  0x97   :  { %v211_v43 = vadd.f32 %v560_v18, %v210_v41  ;;  %v231_v44 = vadd.f32 %v560_v18, %v230_v42 }
  0x98   :  { %v302_v45 = vpack.c.bf16 %v248_v39, %v248_v39  ;;  %v310_v46 = vpack.c.bf16 %v268_v40, %v268_v40 }
  0x99   :  { %v287_v47 = vpack.c.bf16 %v211_v43, %v211_v43  ;;  %v295_v48 = vpack.c.bf16 %v231_v44, %v231_v44 }
  0x9a   :  { %335 = vst.msk [vmem:[%s725_s3 + $0x44] sm:$0xf] %vm317_vm1, %v302_v45 }
  0x9b   :  { %343 = vst.msk [vmem:[%s725_s3 + $0x64] sm:$0xf] %vm317_vm1, %v310_v46 }
  0x9c   :  { %320 = vst.msk [vmem:[%s725_s3 + $0x8] sm:$0xf] %vm317_vm1, %v287_v47 }
  0x9d   :  { %328 = vst.msk [vmem:[%s725_s3 + $0x28] sm:$0xf] %vm317_vm1, %v295_v48  ;;  %v250_v49 = vpop.f32.mrf.mxu2  ;;  %v270_v50 = vpop.f32.mrf.mxu3 }
  0x9e   :  { %v251_v51 = vadd.f32 %v560_v18, %v250_v49  ;;  %v271_v52 = vadd.f32 %v560_v18, %v270_v50  ;;  %v212_v53 = vpop.f32.mrf.mxu0  ;;  %v232_v54 = vpop.f32.mrf.mxu1 }
  0x9f   :  { %v213_v55 = vadd.f32 %v560_v18, %v212_v53  ;;  %v233_v56 = vadd.f32 %v560_v18, %v232_v54 }
  0xa0   :  { %v303_v57 = vpack.c.bf16 %v251_v51, %v251_v51  ;;  %v311_v58 = vpack.c.bf16 %v271_v52, %v271_v52 }
  0xa1   :  { %v288_v59 = vpack.c.bf16 %v213_v55, %v213_v55  ;;  %v296_v60 = vpack.c.bf16 %v233_v56, %v233_v56 }
  0xa2   :  { %336 = vst.msk [vmem:[%s725_s3 + $0x48] sm:$0xf] %vm317_vm1, %v303_v57 }
  0xa3   :  { %344 = vst.msk [vmem:[%s725_s3 + $0x68] sm:$0xf] %vm317_vm1, %v311_v58 }
  0xa4   :  { %321 = vst.msk [vmem:[%s725_s3 + $0xc] sm:$0xf] %vm317_vm1, %v288_v59 }
  0xa5   :  { %329 = vst.msk [vmem:[%s725_s3 + $0x2c] sm:$0xf] %vm317_vm1, %v296_v60  ;;  %v252_v61 = vpop.f32.mrf.mxu2  ;;  %v272_v62 = vpop.f32.mrf.mxu3 }
  0xa6   :  { %v253_v63 = vadd.f32 %v560_v18, %v252_v61  ;;  %v273_v0 = vadd.f32 %v560_v18, %v272_v62  ;;  %v215_v1 = vpop.f32.mrf.mxu0  ;;  %v235_v2 = vpop.f32.mrf.mxu1 }
  0xa7   :  { %v216_v3 = vadd.f32 %v560_v18, %v215_v1  ;;  %v236_v4 = vadd.f32 %v560_v18, %v235_v2 }
  0xa8   :  { %v304_v5 = vpack.c.bf16 %v253_v63, %v253_v63  ;;  %v312_v6 = vpack.c.bf16 %v273_v0, %v273_v0 }
  0xa9   :  { %v289_v7 = vpack.c.bf16 %v216_v3, %v216_v3  ;;  %v297_v8 = vpack.c.bf16 %v236_v4, %v236_v4 }
  0xaa   :  { %337 = vst.msk [vmem:[%s725_s3 + $0x4c] sm:$0xf] %vm317_vm1, %v304_v5 }
  0xab   :  { %345 = vst.msk [vmem:[%s725_s3 + $0x6c] sm:$0xf] %vm317_vm1, %v312_v6 }
  0xac   :  { %322 = vst.msk [vmem:[%s725_s3 + $0x10] sm:$0xf] %vm317_vm1, %v289_v7 }
  0xad   :  { %330 = vst.msk [vmem:[%s725_s3 + $0x30] sm:$0xf] %vm317_vm1, %v297_v8  ;;  %v255_v9 = vpop.f32.mrf.mxu2  ;;  %v275_v10 = vpop.f32.mrf.mxu3 }
  0xae   :  { %v256_v11 = vadd.f32 %v560_v18, %v255_v9  ;;  %v276_v12 = vadd.f32 %v560_v18, %v275_v10  ;;  %v217_v13 = vpop.f32.mrf.mxu0  ;;  %v237_v14 = vpop.f32.mrf.mxu1 }
  0xaf   :  { %v218_v15 = vadd.f32 %v560_v18, %v217_v13  ;;  %v238_v16 = vadd.f32 %v560_v18, %v237_v14 }
  0xb0   :  { %v305_v17 = vpack.c.bf16 %v256_v11, %v256_v11  ;;  %v313_v19 = vpack.c.bf16 %v276_v12, %v276_v12 }
  0xb1   :  { %v290_v20 = vpack.c.bf16 %v218_v15, %v218_v15  ;;  %v298_v21 = vpack.c.bf16 %v238_v16, %v238_v16 }
  0xb2   :  { %338 = vst.msk [vmem:[%s725_s3 + $0x50] sm:$0xf] %vm317_vm1, %v305_v17 }
  0xb3   :  { %346 = vst.msk [vmem:[%s725_s3 + $0x70] sm:$0xf] %vm317_vm1, %v313_v19 }
  0xb4   :  { %323 = vst.msk [vmem:[%s725_s3 + $0x14] sm:$0xf] %vm317_vm1, %v290_v20 }
  0xb5   :  { %331 = vst.msk [vmem:[%s725_s3 + $0x34] sm:$0xf] %vm317_vm1, %v298_v21  ;;  %v257_v22 = vpop.f32.mrf.mxu2  ;;  %v277_v23 = vpop.f32.mrf.mxu3 }
  0xb6   :  { %v258_v24 = vadd.f32 %v560_v18, %v257_v22  ;;  %v278_v25 = vadd.f32 %v560_v18, %v277_v23  ;;  %v220_v26 = vpop.f32.mrf.mxu0  ;;  %v240_v27 = vpop.f32.mrf.mxu1 }
  0xb7   :  { %v221_v28 = vadd.f32 %v560_v18, %v220_v26  ;;  %v241_v29 = vadd.f32 %v560_v18, %v240_v27 }
  0xb8   :  { %v306_v30 = vpack.c.bf16 %v258_v24, %v258_v24  ;;  %v314_v31 = vpack.c.bf16 %v278_v25, %v278_v25 }
  0xb9   :  { %v291_v32 = vpack.c.bf16 %v221_v28, %v221_v28  ;;  %v299_v33 = vpack.c.bf16 %v241_v29, %v241_v29 }
  0xba   :  { %339 = vst.msk [vmem:[%s725_s3 + $0x54] sm:$0xf] %vm317_vm1, %v306_v30 }
  0xbb   :  { %347 = vst.msk [vmem:[%s725_s3 + $0x74] sm:$0xf] %vm317_vm1, %v314_v31 }
  0xbc   :  { %324 = vst.msk [vmem:[%s725_s3 + $0x18] sm:$0xf] %vm317_vm1, %v291_v32 }
  0xbd   :  { %332 = vst.msk [vmem:[%s725_s3 + $0x38] sm:$0xf] %vm317_vm1, %v299_v33  ;;  %v260_v34 = vpop.f32.mrf.mxu2  ;;  %v280_v35 = vpop.f32.mrf.mxu3 }
  0xbe   :  { %v261_v36 = vadd.f32 %v560_v18, %v260_v34  ;;  %v281_v37 = vadd.f32 %v560_v18, %v280_v35  ;;  %v222_v38 = vpop.f32.mrf.mxu0  ;;  %v242_v39 = vpop.f32.mrf.mxu1 }
  0xbf   :  { %v223_v40 = vadd.f32 %v560_v18, %v222_v38  ;;  %v243_v41 = vadd.f32 %v560_v18, %v242_v39 }
  0xc0   :  { %v307_v42 = vpack.c.bf16 %v261_v36, %v261_v36  ;;  %v315_v43 = vpack.c.bf16 %v281_v37, %v281_v37 }
  0xc1   :  { %v292_v44 = vpack.c.bf16 %v223_v40, %v223_v40  ;;  %v300_v45 = vpack.c.bf16 %v243_v41, %v243_v41 }
  0xc2   :  { %340 = vst.msk [vmem:[%s725_s3 + $0x58] sm:$0xf] %vm317_vm1, %v307_v42 }
  0xc3   :  { %348 = vst.msk [vmem:[%s725_s3 + $0x78] sm:$0xf] %vm317_vm1, %v315_v43 }
  0xc4   :  { %325 = vst.msk [vmem:[%s725_s3 + $0x1c] sm:$0xf] %vm317_vm1, %v292_v44 }
  0xc5   :  { %333 = vst.msk [vmem:[%s725_s3 + $0x3c] sm:$0xf] %vm317_vm1, %v300_v45  ;;  %v262_v46 = vpop.f32.mrf.mxu2  ;;  %v282_v47 = vpop.f32.mrf.mxu3 }
  0xc6   :  { %v263_v48 = vadd.f32 %v560_v18, %v262_v46  ;;  %v283_v49 = vadd.f32 %v560_v18, %v282_v47 }
  0xc8   :  { %v308_v50 = vpack.c.bf16 %v263_v48, %v263_v48  ;;  %v316_v51 = vpack.c.bf16 %v283_v49, %v283_v49 }
  0xca   :  { %341 = vst.msk [vmem:[%s725_s3 + $0x5c] sm:$0xf] %vm317_vm1, %v308_v50 }
  0xcb   :  { %349 = vst.msk [vmem:[%s725_s3 + $0x7c] sm:$0xf] %vm317_vm1, %v316_v51 }

// kernel: _lambda_.3
= control target key start
LH: loop header
LB: loop body
LE: loop exit
PB: predicated region body
PF: predicated region fallthrough
CT: control target
= control target key end

     0   :  { %vm139_vm0 = vcmask 130048   ;;  %vm309_vm1 = vcmask 257024   ;;  %s703_s1 = inlined_call_operand.vmem [shape: bf16[16,32], index: 1, kind: input, shape index: {}]   ;;  %s704_s0 = inlined_call_operand.vmem [shape: bf16[256,16], index: 0, kind: input, shape index: {}]   ;;  %s705_s2 = inlined_call_operand.vmem [shape: f32[1,32], index: 2, kind: input, shape index: {}]   ;;  %s706_s3 = inlined_call_operand.vmem [shape: bf16[256,32], index: 3, kind: output, shape index: {}]  }
   0x1   :  { %v446_v0 = vld [vmem:[%s703_s1] sm:$0xff]  ;;  %v431_v5 = vld [vmem:[%s704_s0 + $0x8] sm:$0xff]  ;;  %v432_v9 = vld [vmem:[%s704_s0 + $0x10] sm:$0xff] }
   0x2   :  { %v430_v1 = vld [vmem:[%s704_s0] sm:$0xff]  ;;  %195 = vmatpush.bf16.msra.mxu0 %v446_v0  ;;  %447 = vmatpush.bf16.msra.mxu1 %v446_v0  ;;  %v435_v6 = vld [vmem:[%s704_s0 + $0x28] sm:$0xff]  ;;  %v436_v10 = vld [vmem:[%s704_s0 + $0x30] sm:$0xff] }
   0x3   :  { %v434_v2 = vld [vmem:[%s704_s0 + $0x20] sm:$0xff]  ;;  %448 = vmatpush.bf16.msra.mxu2 %v446_v0  ;;  %449 = vmatpush.bf16.msra.mxu3 %v446_v0  ;;  %v439_v7 = vld [vmem:[%s704_s0 + $0x48] sm:$0xff]  ;;  %v440_v11 = vld [vmem:[%s704_s0 + $0x50] sm:$0xff] }
   0x4   :  { %v438_v3 = vld [vmem:[%s704_s0 + $0x40] sm:$0xff]  ;;  %v443_v8 = vld [vmem:[%s704_s0 + $0x68] sm:$0xff]  ;;  %v444_v12 = vld [vmem:[%s704_s0 + $0x70] sm:$0xff] }
   0x5   :  { %v442_v4 = vld [vmem:[%s704_s0 + $0x60] sm:$0xff]  ;;  %414 = vmatmul.msk.bf16.vlgmr.msra.gmra.mxu0 %vm139_vm0, %v430_v1  ;;  %418 = vmatmul.msk.bf16.vlgmr.msra.gmra.mxu1 %vm139_vm0, %v434_v2  ;;  %v433_v13 = vld [vmem:[%s704_s0 + $0x18] sm:$0xff] }
   0x6   :  { %422 = vmatmul.msk.bf16.vlgmr.msra.gmra.mxu2 %vm139_vm0, %v438_v3  ;;  %426 = vmatmul.msk.bf16.vlgmr.msra.gmra.mxu3 %vm139_vm0, %v442_v4  ;;  %v437_v14 = vld [vmem:[%s704_s0 + $0x38] sm:$0xff]  ;;  %v541_v17 = vld [vmem:[%s705_s2] ss:$0 sm:$0xff] }
   0x7   :  { %v441_v15 = vld [vmem:[%s704_s0 + $0x58] sm:$0xff] }
   0x8   :  { %v445_v16 = vld [vmem:[%s704_s0 + $0x78] sm:$0xff] }
  0x15   :  { %415 = vmatmul.msk.bf16.gmra.mxu0 %vm139_vm0, %v431_v5  ;;  %419 = vmatmul.msk.bf16.gmra.mxu1 %vm139_vm0, %v435_v6 }
  0x16   :  { %423 = vmatmul.msk.bf16.gmra.mxu2 %vm139_vm0, %v439_v7  ;;  %427 = vmatmul.msk.bf16.gmra.mxu3 %vm139_vm0, %v443_v8 }
  0x25   :  { %416 = vmatmul.msk.bf16.gmra.mxu0 %vm139_vm0, %v432_v9  ;;  %420 = vmatmul.msk.bf16.gmra.mxu1 %vm139_vm0, %v436_v10 }
  0x26   :  { %424 = vmatmul.msk.bf16.gmra.mxu2 %vm139_vm0, %v440_v11  ;;  %428 = vmatmul.msk.bf16.gmra.mxu3 %vm139_vm0, %v444_v12 }
  0x35   :  { %417 = vmatmul.msk.bf16.gmra.mxu0 %vm139_vm0, %v433_v13  ;;  %421 = vmatmul.msk.bf16.gmra.mxu1 %vm139_vm0, %v437_v14 }
  0x36   :  { %425 = vmatmul.msk.bf16.gmra.mxu2 %vm139_vm0, %v441_v15  ;;  %429 = vmatmul.msk.bf16.gmra.mxu3 %vm139_vm0, %v445_v16 }
  0x82   :  { %v197_v18 = vpop.f32.mrf.mxu0  ;;  %v217_v19 = vpop.f32.mrf.mxu1 }
  0x83   :  { %v198_v20 = vadd.f32 %v541_v17, %v197_v18  ;;  %v218_v21 = vadd.f32 %v541_v17, %v217_v19 }
  0x85   :  { %v277_v22 = vpack.c.bf16 %v198_v20, %v198_v20  ;;  %v285_v23 = vpack.c.bf16 %v218_v21, %v218_v21 }
  0x87   :  { %310 = vst.msk [vmem:[%s706_s3] sm:$0xf] %vm309_vm1, %v277_v22 }
  0x88   :  { %318 = vst.msk [vmem:[%s706_s3 + $0x20] sm:$0xf] %vm309_vm1, %v285_v23 }
  0x89   :  { %v237_v24 = vpop.f32.mrf.mxu2  ;;  %v257_v25 = vpop.f32.mrf.mxu3 }
  0x8a   :  { %v238_v26 = vadd.f32 %v541_v17, %v237_v24  ;;  %v258_v27 = vadd.f32 %v541_v17, %v257_v25  ;;  %v199_v28 = vpop.f32.mrf.mxu0  ;;  %v219_v29 = vpop.f32.mrf.mxu1 }
  0x8b   :  { %v200_v30 = vadd.f32 %v541_v17, %v199_v28  ;;  %v220_v31 = vadd.f32 %v541_v17, %v219_v29 }
  0x8c   :  { %v293_v32 = vpack.c.bf16 %v238_v26, %v238_v26  ;;  %v301_v33 = vpack.c.bf16 %v258_v27, %v258_v27 }
  0x8d   :  { %v278_v34 = vpack.c.bf16 %v200_v30, %v200_v30  ;;  %v286_v35 = vpack.c.bf16 %v220_v31, %v220_v31 }
  0x8e   :  { %326 = vst.msk [vmem:[%s706_s3 + $0x40] sm:$0xf] %vm309_vm1, %v293_v32 }
  0x8f   :  { %334 = vst.msk [vmem:[%s706_s3 + $0x60] sm:$0xf] %vm309_vm1, %v301_v33 }
  0x90   :  { %311 = vst.msk [vmem:[%s706_s3 + $0x4] sm:$0xf] %vm309_vm1, %v278_v34 }
  0x91   :  { %319 = vst.msk [vmem:[%s706_s3 + $0x24] sm:$0xf] %vm309_vm1, %v286_v35  ;;  %v239_v36 = vpop.f32.mrf.mxu2  ;;  %v259_v37 = vpop.f32.mrf.mxu3 }
  0x92   :  { %v240_v38 = vadd.f32 %v541_v17, %v239_v36  ;;  %v260_v39 = vadd.f32 %v541_v17, %v259_v37  ;;  %v202_v40 = vpop.f32.mrf.mxu0  ;;  %v222_v41 = vpop.f32.mrf.mxu1 }
  0x93   :  { %v203_v42 = vadd.f32 %v541_v17, %v202_v40  ;;  %v223_v43 = vadd.f32 %v541_v17, %v222_v41 }
  0x94   :  { %v294_v44 = vpack.c.bf16 %v240_v38, %v240_v38  ;;  %v302_v45 = vpack.c.bf16 %v260_v39, %v260_v39 }
  0x95   :  { %v279_v46 = vpack.c.bf16 %v203_v42, %v203_v42  ;;  %v287_v47 = vpack.c.bf16 %v223_v43, %v223_v43 }
  0x96   :  { %327 = vst.msk [vmem:[%s706_s3 + $0x44] sm:$0xf] %vm309_vm1, %v294_v44 }
  0x97   :  { %335 = vst.msk [vmem:[%s706_s3 + $0x64] sm:$0xf] %vm309_vm1, %v302_v45 }
  0x98   :  { %312 = vst.msk [vmem:[%s706_s3 + $0x8] sm:$0xf] %vm309_vm1, %v279_v46 }
  0x99   :  { %320 = vst.msk [vmem:[%s706_s3 + $0x28] sm:$0xf] %vm309_vm1, %v287_v47  ;;  %v242_v48 = vpop.f32.mrf.mxu2  ;;  %v262_v49 = vpop.f32.mrf.mxu3 }
  0x9a   :  { %v243_v50 = vadd.f32 %v541_v17, %v242_v48  ;;  %v263_v51 = vadd.f32 %v541_v17, %v262_v49  ;;  %v204_v52 = vpop.f32.mrf.mxu0  ;;  %v224_v53 = vpop.f32.mrf.mxu1 }
  0x9b   :  { %v205_v54 = vadd.f32 %v541_v17, %v204_v52  ;;  %v225_v55 = vadd.f32 %v541_v17, %v224_v53 }
  0x9c   :  { %v295_v56 = vpack.c.bf16 %v243_v50, %v243_v50  ;;  %v303_v57 = vpack.c.bf16 %v263_v51, %v263_v51 }
  0x9d   :  { %v280_v58 = vpack.c.bf16 %v205_v54, %v205_v54  ;;  %v288_v59 = vpack.c.bf16 %v225_v55, %v225_v55 }
  0x9e   :  { %328 = vst.msk [vmem:[%s706_s3 + $0x48] sm:$0xf] %vm309_vm1, %v295_v56 }
  0x9f   :  { %336 = vst.msk [vmem:[%s706_s3 + $0x68] sm:$0xf] %vm309_vm1, %v303_v57 }
  0xa0   :  { %313 = vst.msk [vmem:[%s706_s3 + $0xc] sm:$0xf] %vm309_vm1, %v280_v58 }
  0xa1   :  { %321 = vst.msk [vmem:[%s706_s3 + $0x2c] sm:$0xf] %vm309_vm1, %v288_v59  ;;  %v244_v60 = vpop.f32.mrf.mxu2  ;;  %v264_v61 = vpop.f32.mrf.mxu3 }
  0xa2   :  { %v245_v62 = vadd.f32 %v541_v17, %v244_v60  ;;  %v265_v63 = vadd.f32 %v541_v17, %v264_v61  ;;  %v207_v0 = vpop.f32.mrf.mxu0  ;;  %v227_v1 = vpop.f32.mrf.mxu1 }
  0xa3   :  { %v208_v2 = vadd.f32 %v541_v17, %v207_v0  ;;  %v228_v3 = vadd.f32 %v541_v17, %v227_v1 }
  0xa4   :  { %v296_v4 = vpack.c.bf16 %v245_v62, %v245_v62  ;;  %v304_v5 = vpack.c.bf16 %v265_v63, %v265_v63 }
  0xa5   :  { %v281_v6 = vpack.c.bf16 %v208_v2, %v208_v2  ;;  %v289_v7 = vpack.c.bf16 %v228_v3, %v228_v3 }
  0xa6   :  { %329 = vst.msk [vmem:[%s706_s3 + $0x4c] sm:$0xf] %vm309_vm1, %v296_v4 }
  0xa7   :  { %337 = vst.msk [vmem:[%s706_s3 + $0x6c] sm:$0xf] %vm309_vm1, %v304_v5 }
  0xa8   :  { %314 = vst.msk [vmem:[%s706_s3 + $0x10] sm:$0xf] %vm309_vm1, %v281_v6 }
  0xa9   :  { %322 = vst.msk [vmem:[%s706_s3 + $0x30] sm:$0xf] %vm309_vm1, %v289_v7  ;;  %v247_v8 = vpop.f32.mrf.mxu2  ;;  %v267_v9 = vpop.f32.mrf.mxu3 }
  0xaa   :  { %v248_v10 = vadd.f32 %v541_v17, %v247_v8  ;;  %v268_v11 = vadd.f32 %v541_v17, %v267_v9  ;;  %v209_v12 = vpop.f32.mrf.mxu0  ;;  %v229_v13 = vpop.f32.mrf.mxu1 }
  0xab   :  { %v210_v14 = vadd.f32 %v541_v17, %v209_v12  ;;  %v230_v15 = vadd.f32 %v541_v17, %v229_v13 }
  0xac   :  { %v297_v16 = vpack.c.bf16 %v248_v10, %v248_v10  ;;  %v305_v18 = vpack.c.bf16 %v268_v11, %v268_v11 }
  0xad   :  { %v282_v19 = vpack.c.bf16 %v210_v14, %v210_v14  ;;  %v290_v20 = vpack.c.bf16 %v230_v15, %v230_v15 }
  0xae   :  { %330 = vst.msk [vmem:[%s706_s3 + $0x50] sm:$0xf] %vm309_vm1, %v297_v16 }
  0xaf   :  { %338 = vst.msk [vmem:[%s706_s3 + $0x70] sm:$0xf] %vm309_vm1, %v305_v18 }
  0xb0   :  { %315 = vst.msk [vmem:[%s706_s3 + $0x14] sm:$0xf] %vm309_vm1, %v282_v19 }
  0xb1   :  { %323 = vst.msk [vmem:[%s706_s3 + $0x34] sm:$0xf] %vm309_vm1, %v290_v20  ;;  %v249_v21 = vpop.f32.mrf.mxu2  ;;  %v269_v22 = vpop.f32.mrf.mxu3 }
  0xb2   :  { %v250_v23 = vadd.f32 %v541_v17, %v249_v21  ;;  %v270_v24 = vadd.f32 %v541_v17, %v269_v22  ;;  %v212_v25 = vpop.f32.mrf.mxu0  ;;  %v232_v26 = vpop.f32.mrf.mxu1 }
  0xb3   :  { %v213_v27 = vadd.f32 %v541_v17, %v212_v25  ;;  %v233_v28 = vadd.f32 %v541_v17, %v232_v26 }
  0xb4   :  { %v298_v29 = vpack.c.bf16 %v250_v23, %v250_v23  ;;  %v306_v30 = vpack.c.bf16 %v270_v24, %v270_v24 }
  0xb5   :  { %v283_v31 = vpack.c.bf16 %v213_v27, %v213_v27  ;;  %v291_v32 = vpack.c.bf16 %v233_v28, %v233_v28 }
  0xb6   :  { %331 = vst.msk [vmem:[%s706_s3 + $0x54] sm:$0xf] %vm309_vm1, %v298_v29 }
  0xb7   :  { %339 = vst.msk [vmem:[%s706_s3 + $0x74] sm:$0xf] %vm309_vm1, %v306_v30 }
  0xb8   :  { %316 = vst.msk [vmem:[%s706_s3 + $0x18] sm:$0xf] %vm309_vm1, %v283_v31 }
  0xb9   :  { %324 = vst.msk [vmem:[%s706_s3 + $0x38] sm:$0xf] %vm309_vm1, %v291_v32  ;;  %v252_v33 = vpop.f32.mrf.mxu2  ;;  %v272_v34 = vpop.f32.mrf.mxu3 }
  0xba   :  { %v253_v35 = vadd.f32 %v541_v17, %v252_v33  ;;  %v273_v36 = vadd.f32 %v541_v17, %v272_v34  ;;  %v214_v37 = vpop.f32.mrf.mxu0  ;;  %v234_v38 = vpop.f32.mrf.mxu1 }
  0xbb   :  { %v215_v39 = vadd.f32 %v541_v17, %v214_v37  ;;  %v235_v40 = vadd.f32 %v541_v17, %v234_v38 }
  0xbc   :  { %v299_v41 = vpack.c.bf16 %v253_v35, %v253_v35  ;;  %v307_v42 = vpack.c.bf16 %v273_v36, %v273_v36 }
  0xbd   :  { %v284_v43 = vpack.c.bf16 %v215_v39, %v215_v39  ;;  %v292_v44 = vpack.c.bf16 %v235_v40, %v235_v40 }
  0xbe   :  { %332 = vst.msk [vmem:[%s706_s3 + $0x58] sm:$0xf] %vm309_vm1, %v299_v41 }
  0xbf   :  { %340 = vst.msk [vmem:[%s706_s3 + $0x78] sm:$0xf] %vm309_vm1, %v307_v42 }
  0xc0   :  { %317 = vst.msk [vmem:[%s706_s3 + $0x1c] sm:$0xf] %vm309_vm1, %v284_v43 }
  0xc1   :  { %325 = vst.msk [vmem:[%s706_s3 + $0x3c] sm:$0xf] %vm309_vm1, %v292_v44  ;;  %v254_v45 = vpop.f32.mrf.mxu2  ;;  %v274_v46 = vpop.f32.mrf.mxu3 }
  0xc2   :  { %v255_v47 = vadd.f32 %v541_v17, %v254_v45  ;;  %v275_v48 = vadd.f32 %v541_v17, %v274_v46 }
  0xc4   :  { %v300_v49 = vpack.c.bf16 %v255_v47, %v255_v47  ;;  %v308_v50 = vpack.c.bf16 %v275_v48, %v275_v48 }
  0xc6   :  { %333 = vst.msk [vmem:[%s706_s3 + $0x5c] sm:$0xf] %vm309_vm1, %v300_v49 }
  0xc7   :  { %341 = vst.msk [vmem:[%s706_s3 + $0x7c] sm:$0xf] %vm309_vm1, %v308_v50 }

// kernel: _lambda_.4
= control target key start
LH: loop header
LB: loop body
LE: loop exit
PB: predicated region body
PF: predicated region fallthrough
CT: control target
= control target key end

     0   :  { %s1257_s12 = smov 0   ;;  %s1259_s13 = smov 0   ;;  %s2062_s0 = inlined_call_operand.vmem [shape: bf16[4,8,8,32], index: 0, kind: input, shape index: {}]   ;;  %s2063_s1 = inlined_call_operand.vmem [shape: f32[3,3,32], index: 1, kind: input, shape index: {}]   ;;  %s2064_s2 = inlined_call_operand.vmem [shape: f32[1,1,32], index: 2, kind: input, shape index: {}]   ;;  %s2065_s3 = inlined_call_operand.vmem [shape: bf16[4,8,8,32], index: 3, kind: output, shape index: {}]  }
   0x1   :  { %s1261_s14 = smov 0  }
   0x2 LB: > { %s22_s15 = sadd.s32 1, %s1230_s13  ;;  %p1104_p0 = scmp.ge.s32.totalorder %s1234_s14, 1  ;;  %s1234_s14 = sphi %s1261_s14, %s13_s14   ;;  %s1230_s13 = sphi %s1259_s13, %s2167_s13   ;;  %s1226_s12 = sphi %s1257_s12, %s2166_s12  }
   0x3   : > { %p23_p1 = scmp.ge.s32.totalorder %s22_s15, 2  ;;  %p175_p2 = scmp.lt.s32.totalorder %s1234_s14, 3 }
   0x5   : > { %s2169_s15 = smov (%p23_p1, %s22_s15), 0  ;;  %p176_p3 = pnand %p1104_p0, %p175_p2 }
   0x7   : > { %179 = sbr.rel (%p176_p3) target bundleno = 221 (0xdd), region = 32 }
   0xc   : > { %vm241_vm0 = vcmask 261120   ;;  %v1236_v0 = vmov 0.0   ;;  %vm243_vm1 = vcmask 254976   ;;  %vm252_vm2 = vcmask 253952   ;;  %s1105_s16 = sshll.u32 %s1226_s12, 1 }
   0xd   : > { %242 = vst.msk [vmem:[#allocation2] sm:$0xff] %vm241_vm0, %v1236_v0  ;;  %p215_p4 = scmp.lt.s32.totalorder %s1105_s16, 3  ;;  %v342_v1 = vld [vmem:[%s2063_s1] sm:$0x7]  ;;  %v343_v25 = vld [vmem:[%s2063_s1 + $0x4] sm:$0x7] }
   0xe   : > { %245 = vst.msk [vmem:[#allocation2 + $0xa0] sm:$0xff] %vm241_vm0, %v1236_v0  ;;  %v1374_v3 = vperm.slane %v342_v1, 1  ;;  %v1376_v4 = vperm.slane %v342_v1, 0  ;;  %v1392_v16 = vperm.slane %v342_v1, 2  ;;  %v1417_v35 = vperm.slane %v343_v25, 0 }
   0xf   : > { %248 = vst.msk [vmem:[#allocation2 + $0x90] sm:$0xff] %vm241_vm0, %v1236_v0  ;;  %s2171_s16 = smov (!%p215_p4, %s1105_s16), 3  ;;  %v344_v39 = vld [vmem:[%s2063_s1 + $0x8] sm:$0x7]  ;;  %v1433_v47 = vperm.slane %v343_v25, 1  ;;  %v1449_v56 = vperm.slane %v343_v25, 2 }
  0x10   : > { %250 = vst.msk [vmem:[#allocation2 + $0x130] sm:$0xff] %vm241_vm0, %v1236_v0  ;;  %s1113_s17 = sshll.u32 %s2171_s16, 5  ;;  %v1451_v57 = vperm.slane %v344_v39, 0  ;;  %v1464_v63 = vperm.slane %v344_v39, 1  ;;  %vm967_vm3 = vcmask 257024  }
  0x11   : > { %244 = vst.msk [vmem:[#allocation2 + $0x8] sm:$0x3] %vm243_vm1, %v1236_v0  ;;  %s1360_s20 = scalar_lea.vmem %s2062_s0, %s1113_s17  ;;  %s1868_s4 = scalar_lea.vmem %s2065_s3, %s1113_s17 }
  0x12   : > { %246 = vst.msk [vmem:[#allocation2 + $0xa8] sm:$0x3] %vm243_vm1, %v1236_v0  ;;  %v1116_v2 = vld [vmem:[%s1360_s20] sm:$0xff]   ;;  %v1147_v5 = vld [vmem:[%s1360_s20 + $0x8] sm:$0xff]   ;;  %v1148_v10 = vld [vmem:[%s1360_s20 + $0x10] sm:$0xff]  }
  0x13   : > { %249 = vst.msk [vmem:[#allocation2 + $0x98] sm:$0x3] %vm243_vm1, %v1236_v0  ;;  %v1117_v8 = vunpack.c.l.bf16 %v1116_v2  ;;  %v1118_v9 = vunpack.c.h.bf16 %v1116_v2  ;;  %v1121_v11 = vunpack.c.l.bf16 %v1147_v5  ;;  %v1122_v17 = vunpack.c.h.bf16 %v1147_v5  ;;  %v1395_v18 = vld [vmem:[%s1360_s20 + $0x18] sm:$0xff]   ;;  %v1150_v21 = vld [vmem:[%s1360_s20 + $0x20] sm:$0xff]   ;;  %v1151_v27 = vld [vmem:[%s1360_s20 + $0x28] sm:$0xff]  }
  0x14   : > { %251 = vst.msk [vmem:[#allocation2 + $0x138] sm:$0x3] %vm243_vm1, %v1236_v0  ;;  %v1125_v20 = vunpack.c.l.bf16 %v1148_v10  ;;  %v1126_v22 = vunpack.c.h.bf16 %v1148_v10  ;;  %v1129_v26 = vunpack.c.l.bf16 %v1395_v18  ;;  %v1409_v28 = vld [vmem:[%s1360_s20 + $0x30] sm:$0xff]   ;;  %v1133_v32 = vunpack.c.l.bf16 %v1150_v21  ;;  %v1414_v33 = vld [vmem:[%s1360_s20 + $0x38] sm:$0xff]  }
  0x15   : > { %253 = vst.msk [vmem:[#allocation2] sm:$0x1] %vm252_vm2, %v1236_v0  ;;  %v1134_v34 = vunpack.c.h.bf16 %v1150_v21  ;;  %v1137_v36 = vunpack.c.l.bf16 %v1151_v27  ;;  %v1138_v37 = vunpack.c.h.bf16 %v1151_v27  ;;  %v1141_v38 = vunpack.c.l.bf16 %v1409_v28 }
  0x16   : > { %254 = vst.msk [vmem:[#allocation2 + $0x10] sm:$0x1] %vm252_vm2, %v1236_v0  ;;  %v1142_v42 = vunpack.c.h.bf16 %v1409_v28  ;;  %v1145_v43 = vunpack.c.l.bf16 %v1414_v33  ;;  %v1130_v48 = vunpack.c.h.bf16 %v1395_v18  ;;  %v1146_v49 = vunpack.c.h.bf16 %v1414_v33 }
  0x17   : > { %255 = vst.msk [vmem:[#allocation2 + $0x20] sm:$0x1] %vm252_vm2, %v1236_v0 }
  0x18   : > { %256 = vst.msk [vmem:[#allocation2 + $0x30] sm:$0x1] %vm252_vm2, %v1236_v0  ;;  %v394_v6 = vld [vmem:[#allocation2 + $0x1] sm:$0xff] }
  0x19   : > { %257 = vst.msk [vmem:[#allocation2 + $0x40] sm:$0x1] %vm252_vm2, %v1236_v0  ;;  %v411_v12 = vmul.f32 %v1374_v3, %v394_v6  ;;  %v402_v13 = vld [vmem:[#allocation2 + $0xa1] sm:$0xff] }
  0x1a   : > { %258 = vst.msk [vmem:[#allocation2 + $0x50] sm:$0x1] %vm252_vm2, %v1236_v0  ;;  %v419_v23 = vmul.f32 %v1374_v3, %v402_v13 }
  0x1b   : > { %259 = vst.msk [vmem:[#allocation2 + $0x60] sm:$0x1] %vm252_vm2, %v1236_v0 }
  0x1c   : > { %260 = vst.msk [vmem:[#allocation2 + $0x70] sm:$0x1] %vm252_vm2, %v1236_v0  ;;  %v345_v7 = vld [vmem:[#allocation2] sm:$0xff] }
  0x1d   : > { %261 = vst.msk [vmem:[#allocation2 + $0x80] sm:$0x1] %vm252_vm2, %v1236_v0  ;;  %v362_v14 = vmul.f32 %v1376_v4, %v345_v7 }
  0x1e   : > { %262 = vst.msk [vmem:[#allocation2 + $0x90] sm:$0x1] %vm252_vm2, %v1236_v0 }
  0x1f   : > { %263 = vst.msk [vmem:[#allocation2 + $0xa0] sm:$0x1] %vm252_vm2, %v1236_v0  ;;  %v427_v29 = vadd.f32 %v411_v12, %v362_v14 }
  0x20   : > { %264 = vst.msk [vmem:[#allocation2 + $0xb0] sm:$0x1] %vm252_vm2, %v1236_v0 }
  0x21   : > { %265 = vst.msk [vmem:[#allocation2 + $0xc0] sm:$0x1] %vm252_vm2, %v1236_v0 }
  0x22   : > { %266 = vst.msk [vmem:[#allocation2 + $0xd0] sm:$0x1] %vm252_vm2, %v1236_v0 }
  0x23   : > { %267 = vst.msk [vmem:[#allocation2 + $0xe0] sm:$0x1] %vm252_vm2, %v1236_v0 }
  0x24   : > { %268 = vst.msk [vmem:[#allocation2 + $0xf0] sm:$0x1] %vm252_vm2, %v1236_v0 }
  0x25   : > { %269 = vst.msk [vmem:[#allocation2 + $0x100] sm:$0x1] %vm252_vm2, %v1236_v0 }
  0x26   : > { %270 = vst.msk [vmem:[#allocation2 + $0x110] sm:$0x1] %vm252_vm2, %v1236_v0  ;;  %v353_v15 = vld [vmem:[#allocation2 + $0xa0] sm:$0xff] }
  0x27   : > { %271 = vst.msk [vmem:[#allocation2 + $0x120] sm:$0x1] %vm252_vm2, %v1236_v0  ;;  %v370_v24 = vmul.f32 %v1376_v4, %v353_v15 }
  0x28   : > { %272 = vst.msk [vmem:[#allocation2 + $0x130] sm:$0x1] %vm252_vm2, %v1236_v0 }
  0x29   : > { %273 = vst.msk [vmem:[#allocation2 + $0x9] sm:$0x1] %vm252_vm2, %v1236_v0  ;;  %v435_v40 = vadd.f32 %v419_v23, %v370_v24 }
  0x2a   : > { %274 = vst.msk [vmem:[#allocation2 + $0x19] sm:$0x1] %vm252_vm2, %v1236_v0 }
  0x2b   : > { %275 = vst.msk [vmem:[#allocation2 + $0x29] sm:$0x1] %vm252_vm2, %v1236_v0 }
  0x2c   : > { %276 = vst.msk [vmem:[#allocation2 + $0x39] sm:$0x1] %vm252_vm2, %v1236_v0 }
  0x2d   : > { %277 = vst.msk [vmem:[#allocation2 + $0x49] sm:$0x1] %vm252_vm2, %v1236_v0 }
  0x2e   : > { %278 = vst.msk [vmem:[#allocation2 + $0x59] sm:$0x1] %vm252_vm2, %v1236_v0 }
  0x2f   : > { %279 = vst.msk [vmem:[#allocation2 + $0x69] sm:$0x1] %vm252_vm2, %v1236_v0 }
  0x30   : > { %280 = vst.msk [vmem:[#allocation2 + $0x79] sm:$0x1] %vm252_vm2, %v1236_v0  ;;  %v443_v19 = vld [vmem:[#allocation2 + $0x2] sm:$0xff] }
  0x31   : > { %281 = vst.msk [vmem:[#allocation2 + $0x89] sm:$0x1] %vm252_vm2, %v1236_v0  ;;  %v460_v31 = vmul.f32 %v1392_v16, %v443_v19 }
  0x32   : > { %282 = vst.msk [vmem:[#allocation2 + $0x99] sm:$0x1] %vm252_vm2, %v1236_v0 }
  0x33   : > { %283 = vst.msk [vmem:[#allocation2 + $0xa9] sm:$0x1] %vm252_vm2, %v1236_v0  ;;  %v1437_v50 = vadd.f32 %v460_v31, %v427_v29 }
  0x34   : > { %284 = vst.msk [vmem:[#allocation2 + $0xb9] sm:$0x1] %vm252_vm2, %v1236_v0 }
  0x35   : > { %285 = vst.msk [vmem:[#allocation2 + $0xc9] sm:$0x1] %vm252_vm2, %v1236_v0 }
  0x36   : > { %286 = vst.msk [vmem:[#allocation2 + $0xd9] sm:$0x1] %vm252_vm2, %v1236_v0 }
  0x37   : > { %287 = vst.msk [vmem:[#allocation2 + $0xe9] sm:$0x1] %vm252_vm2, %v1236_v0 }
  0x38   : > { %288 = vst.msk [vmem:[#allocation2 + $0xf9] sm:$0x1] %vm252_vm2, %v1236_v0 }
  0x39   : > { %289 = vst.msk [vmem:[#allocation2 + $0x109] sm:$0x1] %vm252_vm2, %v1236_v0 }
  0x3a   : > { %290 = vst.msk [vmem:[#allocation2 + $0x119] sm:$0x1] %vm252_vm2, %v1236_v0  ;;  %v451_v30 = vld [vmem:[#allocation2 + $0xa2] sm:$0xff] }
  0x3b   : > { %291 = vst.msk [vmem:[#allocation2 + $0x129] sm:$0x1] %vm252_vm2, %v1236_v0  ;;  %v468_v41 = vmul.f32 %v1392_v16, %v451_v30 }
  0x3c   : > { %292 = vst.msk [vmem:[#allocation2 + $0x139] sm:$0x1] %vm252_vm2, %v1236_v0  ;;  %v1466_v0 = vperm.slane %v344_v39, 2 }
  0x3d   : > { %326 = vst.msk [vmem:[#allocation2 + $0x11] sm:$0xff] %vm241_vm0, %v1117_v8  ;;  %v1468_v1 = vadd.f32 %v468_v41, %v435_v40 }
  0x3e   : > { %327 = vst.msk [vmem:[#allocation2 + $0x21] sm:$0xff] %vm241_vm0, %v1118_v9 }
  0x3f   : > { %328 = vst.msk [vmem:[#allocation2 + $0x31] sm:$0xff] %vm241_vm0, %v1121_v11 }
  0x40   : > { %329 = vst.msk [vmem:[#allocation2 + $0x41] sm:$0xff] %vm241_vm0, %v1122_v17 }
  0x41   : > { %330 = vst.msk [vmem:[#allocation2 + $0x51] sm:$0xff] %vm241_vm0, %v1125_v20 }
  0x42   : > { %331 = vst.msk [vmem:[#allocation2 + $0x61] sm:$0xff] %vm241_vm0, %v1126_v22 }
  0x43   : > { %332 = vst.msk [vmem:[#allocation2 + $0x71] sm:$0xff] %vm241_vm0, %v1129_v26 }
  0x44   : > { %v346_v44 = vld [vmem:[#allocation2 + $0x10] sm:$0xff]  ;;  %334 = vst.msk [vmem:[#allocation2 + $0xb1] sm:$0xff] %vm241_vm0, %v1133_v32 }
  0x45   : > { %v1428_v45 = vld [vmem:[#allocation2 + $0x11] sm:$0xff]  ;;  %v363_v51 = vmul.f32 %v1376_v4, %v346_v44  ;;  %v1442_v53 = vld [vmem:[#allocation2 + $0x20] sm:$0xff]  ;;  %335 = vst.msk [vmem:[#allocation2 + $0xc1] sm:$0xff] %vm241_vm0, %v1134_v34  ;;  %v1484_v9 = vmul.f32 %v1417_v35, %v346_v44 }
  0x46   : > { %v1430_v46 = vld [vmem:[#allocation2 + $0x12] sm:$0xff]  ;;  %v412_v52 = vmul.f32 %v1374_v3, %v1428_v45  ;;  %v1444_v54 = vld [vmem:[#allocation2 + $0x21] sm:$0xff]  ;;  %v364_v58 = vmul.f32 %v1376_v4, %v1442_v53  ;;  %336 = vst.msk [vmem:[#allocation2 + $0xd1] sm:$0xff] %vm241_vm0, %v1137_v36  ;;  %v1507_v19 = vmul.f32 %v1417_v35, %v1442_v53 }
  0x47   : > { %v1446_v55 = vld [vmem:[#allocation2 + $0x22] sm:$0xff]  ;;  %v413_v59 = vmul.f32 %v1374_v3, %v1444_v54  ;;  %v1457_v60 = vld [vmem:[#allocation2 + $0x30] sm:$0xff]  ;;  %v1472_v2 = vmul.f32 %v1392_v16, %v1430_v46  ;;  %337 = vst.msk [vmem:[#allocation2 + $0xe1] sm:$0xff] %vm241_vm0, %v1138_v37 }
  0x48   : > { %v1459_v61 = vld [vmem:[#allocation2 + $0x31] sm:$0xff]  ;;  %v365_v5 = vmul.f32 %v1376_v4, %v1457_v60  ;;  %v1478_v7 = vld [vmem:[#allocation2 + $0x40] sm:$0xff]  ;;  %v1488_v10 = vmul.f32 %v1392_v16, %v1446_v55  ;;  %338 = vst.msk [vmem:[#allocation2 + $0xf1] sm:$0xff] %vm241_vm0, %v1141_v38  ;;  %v1501_v17 = vadd.f32 %v412_v52, %v363_v51  ;;  %v1524_v25 = vmul.f32 %v1417_v35, %v1457_v60 }
  0x49   : > { %v1461_v62 = vld [vmem:[#allocation2 + $0x32] sm:$0xff]  ;;  %v414_v6 = vmul.f32 %v1374_v3, %v1459_v61  ;;  %v1480_v8 = vld [vmem:[#allocation2 + $0x41] sm:$0xff]  ;;  %v366_v11 = vmul.f32 %v1376_v4, %v1478_v7  ;;  %v1503_v18 = vadd.f32 %v413_v59, %v364_v58  ;;  %339 = vst.msk [vmem:[#allocation2 + $0x101] sm:$0xff] %vm241_vm0, %v1142_v42  ;;  %v1543_v32 = vmul.f32 %v1417_v35, %v1478_v7 }
  0x4a   : > { %v415_v12 = vmul.f32 %v1374_v3, %v1480_v8  ;;  %v1494_v13 = vld [vmem:[#allocation2 + $0x42] sm:$0xff]  ;;  %v1496_v14 = vld [vmem:[#allocation2 + $0x50] sm:$0xff]  ;;  %v1511_v20 = vmul.f32 %v1392_v16, %v1461_v62  ;;  %340 = vst.msk [vmem:[#allocation2 + $0x111] sm:$0xff] %vm241_vm0, %v1145_v43 }
  0x4b   : > { %2092 = vst [vmem:[#allocation3_spill] sm:$0xff] %v1496_v14  ;;  %v1498_v15 = vld [vmem:[#allocation2 + $0x51] sm:$0xff]  ;;  %v1515_v22 = vld [vmem:[#allocation2 + $0x60] sm:$0xff]  ;;  %v1520_v24 = vadd.f32 %v414_v6, %v365_v5  ;;  %v367_v26 = vmul.f32 %v1376_v4, %v1496_v14  ;;  %v1539_v31 = vmul.f32 %v1392_v16, %v1494_v13 }
  0x4c   : > { %2093 = vst [vmem:[#allocation4_spill] sm:$0xff] %v1498_v15  ;;  %v1513_v21 = vld [vmem:[#allocation2 + $0x52] sm:$0xff]  ;;  %v1517_v23 = vld [vmem:[#allocation2 + $0x61] sm:$0xff]  ;;  %v416_v27 = vmul.f32 %v1374_v3, %v1498_v15  ;;  %v368_v34 = vmul.f32 %v1376_v4, %v1515_v22  ;;  %v1552_v40 = vadd.f32 %v415_v12, %v366_v11 }
  0x4d   : > { %2094 = vst [vmem:[#allocation5_spill] sm:$0xff] %v1513_v21  ;;  %v1530_v28 = vld [vmem:[#allocation2 + $0x62] sm:$0xff]  ;;  %v1532_v29 = vld [vmem:[#allocation2 + $0x70] sm:$0xff]  ;;  %v417_v36 = vmul.f32 %v1374_v3, %v1517_v23  ;;  %v1556_v41 = vmul.f32 %v1392_v16, %v1513_v21 }
  0x4e   : > { %2095 = vst [vmem:[#allocation6_spill] sm:$0xff] %v1515_v22  ;;  %v1534_v30 = vld [vmem:[#allocation2 + $0x71] sm:$0xff]  ;;  %v369_v42 = vmul.f32 %v1376_v4, %v1532_v29  ;;  %v1562_v44 = vld [vmem:[#allocation2 + $0xc0] sm:$0xff]  ;;  %v1575_v52 = vmul.f32 %v1392_v16, %v1530_v28  ;;  %v1585_v33 = vadd.f32 %v416_v27, %v367_v26  ;;  %v1605_v26 = vmul.f32 %v1417_v35, %v1532_v29 }
  0x4f   : > { %2096 = vst [vmem:[#allocation7_spill] sm:$0xff] %v1517_v23  ;;  %v1549_v37 = vld [vmem:[#allocation2 + $0x72] sm:$0xff]  ;;  %v418_v43 = vmul.f32 %v1374_v3, %v1534_v30  ;;  %v1564_v51 = vld [vmem:[#allocation2 + $0xc1] sm:$0xff] }
  0x50   : > { %2097 = vst [vmem:[#allocation8_spill] sm:$0xff] %v1530_v28  ;;  %v354_v38 = vld [vmem:[#allocation2 + $0xb0] sm:$0xff]  ;;  %v1593_v12 = vmul.f32 %v1392_v16, %v1549_v37  ;;  %v1599_v28 = vadd.f32 %v417_v36, %v368_v34  ;;  %v421_v27 = vmul.f32 %v1374_v3, %v1564_v51 }
  0x51   : > { %2098 = vst [vmem:[#allocation9_spill] sm:$0xff] %v1532_v29  ;;  %v403_v39 = vld [vmem:[#allocation2 + $0xb1] sm:$0xff]  ;;  %v371_v58 = vmul.f32 %v1376_v4, %v354_v38  ;;  %v1601_v23 = vadd.f32 %v418_v43, %v369_v42  ;;  %v517_v43 = vmul.f32 %v1417_v35, %v354_v38 }
  0x52   : > { %2099 = vst [vmem:[#allocation10_spill] sm:$0xff] %v1534_v30  ;;  %v420_v59 = vmul.f32 %v1374_v3, %v403_v39  ;;  %v1579_v5 = vld [vmem:[#allocation2 + $0xb2] sm:$0xff]  ;;  %v372_v30 = vmul.f32 %v1376_v4, %v1562_v44 }
  0x53   : > { %2100 = vst [vmem:[#allocation11_spill] sm:$0xff] %v1539_v31  ;;  %v1581_v6 = vld [vmem:[#allocation2 + $0xd0] sm:$0xff] }
  0x54   : > { %2101 = vst [vmem:[#allocation12_spill] sm:$0xff] %v1543_v32  ;;  %v1583_v11 = vld [vmem:[#allocation2 + $0xd1] sm:$0xff]  ;;  %v373_v34 = vmul.f32 %v1376_v4, %v1581_v6  ;;  %v437_v29 = vadd.f32 %v421_v27, %v372_v30  ;;  %v1651_v30 = vmul.f32 %v1417_v35, %v1581_v6 }
  0x55   : > { %2102 = vst [vmem:[#allocation13_spill] sm:$0xff] %v1549_v37  ;;  %v1611_v37 = vld [vmem:[#allocation2 + $0xe1] sm:$0xff]  ;;  %v422_v36 = vmul.f32 %v1374_v3, %v1583_v11  ;;  %v1619_v42 = vld [vmem:[#allocation2 + $0xf0] sm:$0xff]  ;;  %v1655_v27 = vmul.f32 %v1433_v47, %v1583_v11 }
  0x56   : > { %333 = vst.msk [vmem:[#allocation2 + $0x81] sm:$0xff] %vm241_vm0, %v1130_v48  ;;  %v1571_v48 = vmul.f32 %v1417_v35, %v1496_v14 }
  0x57   : > { %2103 = vst [vmem:[#allocation14_spill] sm:$0xff] %v1552_v40  ;;  %v438_v21 = vadd.f32 %v422_v36, %v373_v34 }
  0x58   : > { %2104 = vst [vmem:[#allocation15_spill] sm:$0xff] %v1556_v41  ;;  %v469_v41 = vmul.f32 %v1392_v16, %v1579_v5 }
  0x59   : > { %341 = vst.msk [vmem:[#allocation2 + $0x121] sm:$0xff] %vm241_vm0, %v1146_v49  ;;  %v1589_v49 = vmul.f32 %v1417_v35, %v1515_v22  ;;  %v1643_v22 = vld [vmem:[#allocation2 + $0xe2] sm:$0xff] }
  0x5a   : > { %2105 = vst [vmem:[#allocation16_spill] sm:$0xff] %v1571_v48  ;;  %v1647_v48 = vld [vmem:[#allocation2 + $0x101] sm:$0xff] }
  0x5b   : > { %2106 = vst [vmem:[#allocation17_spill] sm:$0xff] %v1575_v52  ;;  %v1597_v52 = vld [vmem:[#allocation2 + $0xe0] sm:$0xff] }
  0x5c   : > { %2107 = vst [vmem:[#allocation18_spill] sm:$0xff] %v1581_v6  ;;  %v1663_v40 = vmul.f32 %v1417_v35, %v1597_v52  ;;  %v1671_v6 = vld [vmem:[#allocation2 + $0x110] sm:$0xff] }
  0x5d   : > { %2108 = vst [vmem:[#allocation19_spill] sm:$0xff] %v1583_v11  ;;  %v377_v32 = vmul.f32 %v1376_v4, %v1671_v6 }
  0x5e   : > { %2109 = vst [vmem:[#allocation20_spill] sm:$0xff] %v1585_v33  ;;  %v1637_v33 = vmul.f32 %v1433_v47, %v1564_v51 }
  0x5f   : > { %2110 = vst [vmem:[#allocation21_spill] sm:$0xff] %v1589_v49  ;;  %v1609_v49 = vld [vmem:[#allocation2 + $0xc2] sm:$0xff] }
  0x60   : > { %2111 = vst [vmem:[#allocation22_spill] sm:$0xff] %v1593_v12  ;;  %v436_v12 = vadd.f32 %v420_v59, %v371_v58  ;;  %v1629_v58 = vld [vmem:[#allocation2 + $0xd2] sm:$0xff]  ;;  %v374_v59 = vmul.f32 %v1376_v4, %v1597_v52  ;;  %v470_v38 = vmul.f32 %v1392_v16, %v1609_v49 }
  0x61   : > { %2112 = vst [vmem:[#allocation23_spill] sm:$0xff] %v1597_v52  ;;  %v471_v34 = vmul.f32 %v1392_v16, %v1629_v58  ;;  %v1681_v52 = vld [vmem:[#allocation2 + $0x102] sm:$0xff] }
  0x62   : > { %2113 = vst [vmem:[#allocation24_spill] sm:$0xff] %v1599_v28  ;;  %v1633_v28 = vld [vmem:[#allocation2 + $0xf1] sm:$0xff]  ;;  %v1659_v31 = vadd.f32 %v469_v41, %v436_v12  ;;  %v472_v41 = vmul.f32 %v1392_v16, %v1643_v22 }
  0x63   : > { %2114 = vst [vmem:[#allocation25_spill] sm:$0xff] %v1601_v23  ;;  %v1623_v23 = vmul.f32 %v1433_v47, %v403_v39  ;;  %v423_v39 = vmul.f32 %v1374_v3, %v1611_v37  ;;  %v424_v36 = vmul.f32 %v1374_v3, %v1633_v28 }
  0x64   : > { %2115 = vst [vmem:[#allocation26_spill] sm:$0xff] %v1605_v26  ;;  %v1627_v26 = vmul.f32 %v1417_v35, %v1562_v44 }
  0x65   : > { %2116 = vst [vmem:[#allocation27_spill] sm:$0xff] %v1611_v37  ;;  %v439_v11 = vadd.f32 %v423_v39, %v374_v59  ;;  %v1691_v59 = vmul.f32 %v1417_v35, %v1619_v42  ;;  %v1693_v39 = vld [vmem:[#allocation2 + $0x112] sm:$0xff] }
  0x66   : > { %2117 = vst [vmem:[#allocation28_spill] sm:$0xff] %v1627_v26  ;;  %v1645_v26 = vld [vmem:[#allocation2 + $0x100] sm:$0xff] }
  0x67   : > { %2118 = vst [vmem:[#allocation29_spill] sm:$0xff] %v1629_v58  ;;  %v376_v12 = vmul.f32 %v1376_v4, %v1645_v26  ;;  %v1685_v58 = vmul.f32 %v1433_v47, %v1611_v37 }
  0x68   : > { %2119 = vst [vmem:[#allocation30_spill] sm:$0xff] %v1637_v33  ;;  %v375_v33 = vmul.f32 %v1376_v4, %v1619_v42  ;;  %v1717_v4 = vmul.f32 %v1433_v47, %v1647_v48 }
  0x69   : > { %2120 = vst [vmem:[#allocation31_spill] sm:$0xff] %v1643_v22 }
  0x6a   : > { %2121 = vst [vmem:[#allocation32_spill] sm:$0xff] %v1645_v26  ;;  %v440_v15 = vadd.f32 %v424_v36, %v375_v33  ;;  %v1705_v33 = vadd.f32 %v471_v34, %v438_v21  ;;  %v1713_v36 = vld [vmem:[#allocation2 + $0x80] sm:$0xff]  ;;  %v475_v21 = vmul.f32 %v1392_v16, %v1693_v39 }
  0x6b   : > { %2122 = vst [vmem:[#allocation33_spill] sm:$0xff] %v1651_v30  ;;  %v1669_v30 = vld [vmem:[#allocation2 + $0xf2] sm:$0xff]  ;;  %v1723_v34 = vld [vmem:[#allocation2 + $0x120] sm:$0xff] }
  0x6c   : > { %2123 = vst [vmem:[#allocation34_spill] sm:$0xff] %v1655_v27  ;;  %v1673_v27 = vld [vmem:[#allocation2 + $0x111] sm:$0xff]  ;;  %v473_v14 = vmul.f32 %v1392_v16, %v1669_v30 }
  0x6d   : > { %2124 = vst [vmem:[#allocation35_spill] sm:$0xff] %v1659_v31  ;;  %v1687_v31 = vadd.f32 %v470_v38, %v437_v29  ;;  %v426_v37 = vmul.f32 %v1374_v3, %v1673_v27  ;;  %v1703_v29 = vmul.f32 %v1433_v47, %v1633_v28  ;;  %v1709_v38 = vmul.f32 %v1417_v35, %v1645_v26 }
  0x6e   : > { %2125 = vst [vmem:[#allocation36_spill] sm:$0xff] %v1663_v40  ;;  %v425_v40 = vmul.f32 %v1374_v3, %v1647_v48  ;;  %v1719_v3 = vadd.f32 %v472_v41, %v439_v11  ;;  %v1745_v11 = vmul.f32 %v1417_v35, %v1713_v36  ;;  %v755_v41 = vmul.f32 %v1466_v0, %v1446_v55 }
  0x6f   : > { %2126 = vst [vmem:[#allocation37_spill] sm:$0xff] %v1681_v52 }
  0x70   : > { %v441_v22 = vadd.f32 %v425_v40, %v376_v12  ;;  %2127 = vst [vmem:[#allocation38_spill] sm:$0xff] %v1709_v38  ;;  %v474_v40 = vmul.f32 %v1392_v16, %v1681_v52  ;;  %v442_v12 = vadd.f32 %v426_v37, %v377_v32  ;;  %v1727_v38 = vmul.f32 %v1417_v35, %v1671_v6 }
  0x71   : > { %2128 = vst [vmem:[#allocation39_spill] sm:$0xff] %v1717_v4  ;;  %v525_v52 = vadd.f32 %v1484_v9, %v1437_v50  ;;  %v558_v4 = vmul.f32 %v1433_v47, %v1428_v45  ;;  %v1737_v32 = vmul.f32 %v1433_v47, %v1673_v27  ;;  %v1739_v37 = vadd.f32 %v473_v14, %v440_v15 }
  0x72   : > { %v1729_v26 = vadd.f32 %v474_v40, %v441_v22  ;;  %v1741_v16 = vadd.f32 %v475_v21, %v442_v12  ;;  %v1749_v22 = vmul.f32 %v1417_v35, %v1723_v34  ;;  %v607_v45 = vmul.f32 %v1449_v56, %v1430_v46 }
  0x73   : > { %v574_v50 = vadd.f32 %v558_v4, %v525_v52  ;;  %v533_v9 = vadd.f32 %v517_v43, %v1468_v1  ;;  %v657_v14 = vmul.f32 %v1451_v57, %v1442_v53  ;;  %v706_v15 = vmul.f32 %v1464_v63, %v1444_v54 }
  0x74   : > { %v615_v40 = vmul.f32 %v1449_v56, %v1579_v5  ;;  %v665_v46 = vmul.f32 %v1451_v57, %v1562_v44  ;;  %v477_v1 = vadd.f32 %v1472_v2, %v1501_v17  ;;  %v714_v53 = vmul.f32 %v1464_v63, %v1564_v51 }
  0x75   : > { %v623_v35 = vadd.f32 %v607_v45, %v574_v50  ;;  %v582_v52 = vadd.f32 %v1623_v23, %v533_v9  ;;  %v763_v43 = vmul.f32 %v1466_v0, %v1609_v49  ;;  %v559_v4 = vmul.f32 %v1433_v47, %v1444_v54 }
  0x76   : > { %v608_v5 = vmul.f32 %v1449_v56, %v1446_v55  ;;  %v526_v21 = vadd.f32 %v1507_v19, %v477_v1  ;;  %v478_v44 = vadd.f32 %v1488_v10, %v1503_v18  ;;  %v658_v2 = vmul.f32 %v1451_v57, %v1457_v60  ;;  %v1789_v19 = vld [vmem:[%s2064_s2] ss:$0 sm:$0xff] }
  0x77   : > { %v673_v12 = vadd.f32 %v657_v14, %v623_v35  ;;  %v631_v23 = vadd.f32 %v615_v40, %v582_v52  ;;  %v707_v17 = vmul.f32 %v1464_v63, %v1459_v61  ;;  %v756_v51 = vmul.f32 %v1466_v0, %v1461_v62 }
  0x78   : > { %v560_v54 = vmul.f32 %v1433_v47, %v1459_v61  ;;  %v575_v10 = vadd.f32 %v559_v4, %v526_v21  ;;  %v527_v18 = vadd.f32 %v1524_v25, %v478_v44  ;;  %v609_v60 = vmul.f32 %v1449_v56, %v1461_v62  ;;  %v2129_v25 = vld [vmem:[#allocation12_spill] sm:$0xff]  ;;  %v2132_v21 = vld [vmem:[#allocation14_spill] sm:$0xff]  ;;  %v2133_v44 = vld [vmem:[#allocation11_spill] sm:$0xff] }
  0x79   : > { %v722_v55 = vadd.f32 %v706_v15, %v673_v12  ;;  %v681_v50 = vadd.f32 %v665_v46, %v631_v23  ;;  %v659_v45 = vmul.f32 %v1451_v57, %v1478_v7  ;;  %v708_v9 = vmul.f32 %v1464_v63, %v1480_v8 }
  0x7a   : > { %v479_v61 = vadd.f32 %v1511_v20, %v1520_v24  ;;  %v624_v40 = vadd.f32 %v608_v5, %v575_v10  ;;  %v576_v35 = vadd.f32 %v560_v54, %v527_v18  ;;  %v757_v52 = vmul.f32 %v1466_v0, %v1494_v13  ;;  %v2131_v5 = vld [vmem:[#allocation4_spill] sm:$0xff] }
  0x7b   : > { %v771_v14 = vadd.f32 %v755_v41, %v722_v55  ;;  %v730_v15 = vadd.f32 %v714_v53, %v681_v50  ;;  %v561_v62 = vmul.f32 %v1433_v47, %v1480_v8  ;;  %v610_v7 = vmul.f32 %v1449_v56, %v1494_v13  ;;  %v2130_v41 = vld [vmem:[#allocation3_spill] sm:$0xff]  ;;  %v2134_v13 = vld [vmem:[#allocation5_spill] sm:$0xff]  ;;  %v2135_v18 = vld [vmem:[#allocation16_spill] sm:$0xff] }
  0x7c   : > { %v528_v46 = vadd.f32 %v2129_v25, %v479_v61  ;;  %v674_v12 = vadd.f32 %v658_v2, %v624_v40  ;;  %v625_v20 = vadd.f32 %v609_v60, %v576_v35  ;;  %v660_v53 = vmul.f32 %v1451_v57, %v2130_v41 }
  0x7d   : > { %v791_v1 = vadd.f32 %v1789_v19, %v771_v14  ;;  %v779_v4 = vadd.f32 %v763_v43, %v730_v15  ;;  %v709_v23 = vmul.f32 %v1464_v63, %v2131_v5  ;;  %v480_v54 = vadd.f32 %v2133_v44, %v2132_v21  ;;  %v2137_v21 = vld [vmem:[#allocation20_spill] sm:$0xff] }
  0x7e   : > { %v577_v24 = vadd.f32 %v561_v62, %v528_v46  ;;  %v723_v50 = vadd.f32 %v707_v17, %v674_v12  ;;  %v758_v10 = vmul.f32 %v1466_v0, %v2134_v13  ;;  %v675_v43 = vadd.f32 %v659_v45, %v625_v20 }
  0x7f   : > { %v823_v55 = vmul.f32 0.044715, %v791_v1  ;;  %v799_v8 = vadd.f32 %v1789_v19, %v779_v4  ;;  %v529_v60 = vadd.f32 %v2135_v18, %v480_v54  ;;  %v562_v61 = vmul.f32 %v1433_v47, %v2131_v5  ;;  %v2140_v18 = vld [vmem:[#allocation21_spill] sm:$0xff] }
  0x80   : > { %v626_v2 = vadd.f32 %v610_v7, %v577_v24  ;;  %v772_v40 = vadd.f32 %v756_v51, %v723_v50  ;;  %v611_v35 = vmul.f32 %v1449_v56, %v2134_v13  ;;  %v1822_v25 = vmul.f32 0.5, %v791_v1  ;;  %v2136_v7 = vld [vmem:[#allocation6_spill] sm:$0xff]  ;;  %v2138_v51 = vld [vmem:[#allocation15_spill] sm:$0xff] }
  0x81   : > { %v839_v14 = vmul.f32 %v823_v55, %v791_v1  ;;  %v831_v15 = vmul.f32 0.044715, %v799_v8  ;;  %v724_v46 = vadd.f32 %v708_v9, %v675_v43  ;;  %v578_v62 = vadd.f32 %v562_v61, %v529_v60  ;;  %v2139_v13 = vld [vmem:[#allocation7_spill] sm:$0xff] }
  0x82   : > { %v676_v17 = vadd.f32 %v660_v53, %v626_v2  ;;  %v792_v45 = vadd.f32 %v1789_v19, %v772_v40  ;;  %v661_v20 = vmul.f32 %v1451_v57, %v2136_v7  ;;  %v481_v44 = vadd.f32 %v2138_v51, %v2137_v21 }
  0x83   : > { %v855_v4 = vmul.f32 %v839_v14, %v791_v1  ;;  %v847_v12 = vmul.f32 %v831_v15, %v799_v8  ;;  %v773_v24 = vadd.f32 %v757_v52, %v724_v46  ;;  %v627_v5 = vadd.f32 %v611_v35, %v578_v62  ;;  %v2141_v35 = vld [vmem:[#allocation8_spill] sm:$0xff] }
  0x84   : > { %v725_v41 = vadd.f32 %v709_v23, %v676_v17  ;;  %v824_v50 = vmul.f32 0.044715, %v792_v45  ;;  %v710_v9 = vmul.f32 %v1464_v63, %v2139_v13  ;;  %v530_v60 = vadd.f32 %v2140_v18, %v481_v44 }
  0x85   : > { %v871_v54 = vadd.f32 %v855_v4, %v791_v1  ;;  %v863_v55 = vmul.f32 %v847_v12, %v799_v8  ;;  %v793_v53 = vadd.f32 %v1789_v19, %v773_v24  ;;  %v677_v2 = vadd.f32 %v661_v20, %v627_v5 }
  0x86   : > { %v774_v43 = vadd.f32 %v758_v10, %v725_v41  ;;  %v840_v52 = vmul.f32 %v824_v50, %v792_v45  ;;  %v563_v23 = vmul.f32 %v1433_v47, %v2139_v13  ;;  %v759_v46 = vmul.f32 %v1466_v0, %v2141_v35  ;;  %v2142_v50 = vld [vmem:[#allocation9_spill] sm:$0xff] }
  0x87   : > { %v887_v61 = vmul.f32 0.7978846, %v871_v54  ;;  %v879_v14 = vadd.f32 %v863_v55, %v799_v8  ;;  %v825_v15 = vmul.f32 0.044715, %v793_v53  ;;  %v726_v40 = vadd.f32 %v710_v9, %v677_v2  ;;  %v2143_v9 = vld [vmem:[#allocation24_spill] sm:$0xff] }
  0x88   : > { %v1836_v1 = vadd.f32 %v1789_v19, %v774_v43  ;;  %v856_v10 = vmul.f32 %v840_v52, %v792_v45  ;;  %v579_v62 = vadd.f32 %v563_v23, %v530_v60  ;;  %v815_v4 = vmul.f32 0.5, %v799_v8  ;;  %v2144_v43 = vld [vmem:[#allocation17_spill] sm:$0xff] }
  0x89   : > { %1180 = vtanh.f32 %v887_v61  ;;  %v895_v17 = vmul.f32 0.7978846, %v879_v14  ;;  %v841_v12 = vmul.f32 %v825_v15, %v793_v53  ;;  %v775_v20 = vadd.f32 %v759_v46, %v726_v40  ;;  %v2145_v61 = vld [vmem:[#allocation10_spill] sm:$0xff] }
  0x8a   : > { %v826_v7 = vmul.f32 0.044715, %v1836_v1  ;;  %v808_v24 = vmul.f32 0.5, %v792_v45  ;;  %v872_v41 = vadd.f32 %v856_v10, %v792_v45  ;;  %v612_v5 = vmul.f32 %v1449_v56, %v2141_v35  ;;  %v2146_v15 = vld [vmem:[#allocation26_spill] sm:$0xff] }
  0x8b   : > { %1182 = vtanh.f32 %v895_v17  ;;  %v1843_v21 = vmul.f32 0.5, %v793_v53  ;;  %v857_v51 = vmul.f32 %v841_v12, %v793_v53  ;;  %v795_v54 = vadd.f32 %v1789_v19, %v775_v20  ;;  %v548_v12 = vld [vmem:[#allocation2 + $0x81] sm:$0xff]  ;;  %v2147_v20 = vld [vmem:[#allocation13_spill] sm:$0xff] }
  0x8c   : > { %v842_v44 = vmul.f32 %v826_v7, %v1836_v1  ;;  %v888_v55 = vmul.f32 0.7978846, %v872_v41  ;;  %v628_v8 = vadd.f32 %v612_v5, %v579_v62  ;;  %v662_v13 = vmul.f32 %v1451_v57, %v2142_v50 }
  0x8d   : > { %v482_v2 = vadd.f32 %v2144_v43, %v2143_v9  ;;  %v873_v18 = vadd.f32 %v857_v51, %v793_v53  ;;  %v827_v60 = vmul.f32 0.044715, %v795_v54  ;;  %v711_v14 = vmul.f32 %v1464_v63, %v2145_v61 }
  0x8e   : > { %v858_v45 = vmul.f32 %v842_v44, %v1836_v1  ;;  %1184 = vtanh.f32 %v888_v55  ;;  %v678_v23 = vadd.f32 %v662_v13, %v628_v8  ;;  %v564_v35 = vmul.f32 %v1433_v47, %v2145_v61 }
  0x8f   : > { %v1181_v52 = vpop.eup %1180  ;;  %v531_v40 = vadd.f32 %v2146_v15, %v482_v2  ;;  %v889_v17 = vmul.f32 0.7978846, %v873_v18  ;;  %v843_v53 = vmul.f32 %v827_v60, %v795_v54  ;;  %v760_v41 = vmul.f32 %v1466_v0, %v2147_v20  ;;  %v2149_v15 = vld [vmem:[#allocation22_spill] sm:$0xff] }
  0x90   : > { %v919_v46 = vadd.f32 1.0, %v1181_v52  ;;  %v874_v10 = vadd.f32 %v858_v45, %v1836_v1  ;;  %v727_v7 = vadd.f32 %v711_v14, %v678_v23  ;;  %v613_v51 = vmul.f32 %v1449_v56, %v2147_v20  ;;  %v744_v45 = vld [vmem:[#allocation2 + $0x82] sm:$0xff]  ;;  %v2148_v23 = vld [vmem:[#allocation25_spill] sm:$0xff] }
  0x91   : > { %v1183_v62 = vpop.eup %1182  ;;  %v580_v5 = vadd.f32 %v564_v35, %v531_v40  ;;  %1186 = vtanh.f32 %v889_v17  ;;  %v859_v50 = vmul.f32 %v843_v53, %v795_v54  ;;  %v663_v43 = vmul.f32 %v1451_v57, %v1713_v36 }
  0x92   : > { %v935_v44 = vmul.f32 %v919_v46, %v1822_v25  ;;  %v927_v55 = vadd.f32 1.0, %v1183_v62  ;;  %v890_v8 = vmul.f32 0.7978846, %v874_v10  ;;  %v776_v13 = vadd.f32 %v760_v41, %v727_v7  ;;  %v647_v7 = vld [vmem:[#allocation2 + $0x90] sm:$0xff] }
  0x93   : > { %v629_v9 = vadd.f32 %v613_v51, %v580_v5  ;;  %v712_v25 = vmul.f32 %v1464_v63, %v548_v12  ;;  %v875_v61 = vadd.f32 %v859_v50, %v795_v54  ;;  %v483_v40 = vadd.f32 %v2149_v15, %v2148_v23  ;;  %v2152_v23 = vld [vmem:[#allocation30_spill] sm:$0xff] }
  0x94   : > { %v951_v2 = vpack.c.bf16 %v935_v44, %v935_v44  ;;  %v943_v18 = vmul.f32 %v927_v55, %v815_v4  ;;  %1188 = vtanh.f32 %v890_v8  ;;  %v1185_v60 = vpop.eup %1184  ;;  %v1874_v14 = vadd.f32 %v1789_v19, %v776_v13  ;;  %v696_v8 = vld [vmem:[#allocation2 + $0x91] sm:$0xff] }
  0x95   : > { %v679_v52 = vadd.f32 %v663_v43, %v629_v9  ;;  %v920_v36 = vadd.f32 1.0, %v1185_v60  ;;  %v810_v4 = vmul.f32 0.5, %v1836_v1  ;;  %v811_v46 = vmul.f32 0.5, %v795_v54 }
  0x96   : > { %968 = vst.msk [vmem:[%s1868_s4] sm:$0xf] %vm967_vm3, %v951_v2  ;;  %v959_v35 = vpack.c.bf16 %v943_v18, %v943_v18  ;;  %v891_v17 = vmul.f32 0.7978846, %v875_v61  ;;  %v828_v10 = vmul.f32 0.044715, %v1874_v14  ;;  %v761_v62 = vmul.f32 %v1466_v0, %v744_v45 }
  0x97   : > { %v728_v53 = vadd.f32 %v712_v25, %v679_v52  ;;  %v1187_v20 = vpop.eup %1186  ;;  %v936_v41 = vmul.f32 %v920_v36, %v808_v24  ;;  %v532_v5 = vadd.f32 %v1745_v11, %v483_v40  ;;  %v565_v51 = vmul.f32 %v1433_v47, %v548_v12  ;;  %v745_v2 = vld [vmem:[#allocation2 + $0x92] sm:$0xff]  ;;  %v2150_v24 = vld [vmem:[#allocation35_spill] sm:$0xff]  ;;  %v2151_v18 = vld [vmem:[#allocation28_spill] sm:$0xff] }
  0x98   : > { %976 = vst.msk [vmem:[%s1868_s4 + $0x20] sm:$0xf] %vm967_vm3, %v959_v35  ;;  %v614_v44 = vmul.f32 %v744_v45, %v1449_v56  ;;  %v921_v1 = vadd.f32 1.0, %v1187_v20  ;;  %1190 = vtanh.f32 %v891_v17  ;;  %v844_v54 = vmul.f32 %v828_v10, %v1874_v14 }
  0x99   : > { %v777_v55 = vadd.f32 %v761_v62, %v728_v53  ;;  %v952_v13 = vpack.c.bf16 %v936_v41, %v936_v41  ;;  %v581_v9 = vadd.f32 %v565_v51, %v532_v5  ;;  %v664_v43 = vmul.f32 %v1451_v57, %v647_v7  ;;  %v2153_v7 = vld [vmem:[#allocation18_spill] sm:$0xff] }
  0x9a   : > { %v1189_v50 = vpop.eup %1188  ;;  %v534_v11 = vadd.f32 %v2151_v18, %v2150_v24  ;;  %v937_v12 = vmul.f32 %v921_v1, %v1843_v21  ;;  %v860_v45 = vmul.f32 %v844_v54, %v1874_v14  ;;  %v713_v52 = vmul.f32 %v1464_v63, %v696_v8  ;;  %v1914_v54 = vld [vmem:[#allocation2 + $0x121] sm:$0xff] }
  0x9b   : > { %v922_v25 = vadd.f32 1.0, %v1189_v50  ;;  %v1895_v60 = vadd.f32 %v1789_v19, %v777_v55  ;;  %969 = vst.msk [vmem:[%s1868_s4 + $0x4] sm:$0xf] %vm967_vm3, %v952_v13  ;;  %v630_v61 = vadd.f32 %v614_v44, %v581_v9  ;;  %v616_v40 = vmul.f32 %v1449_v56, %v1609_v49  ;;  %v2154_v49 = vld [vmem:[#allocation19_spill] sm:$0xff]  ;;  %v2155_v44 = vld [vmem:[#allocation33_spill] sm:$0xff] }
  0x9c   : > { %v583_v15 = vadd.f32 %v2152_v23, %v534_v11  ;;  %v953_v35 = vpack.c.bf16 %v937_v12, %v937_v12  ;;  %v876_v21 = vadd.f32 %v860_v45, %v1874_v14  ;;  %v762_v17 = vmul.f32 %v1466_v0, %v745_v2  ;;  %v2156_v9 = vld [vmem:[#allocation29_spill] sm:$0xff]  ;;  %v2157_v2 = vld [vmem:[#allocation34_spill] sm:$0xff] }
  0x9d   : > { %v938_v36 = vmul.f32 %v922_v25, %v810_v4  ;;  %v829_v10 = vmul.f32 0.044715, %v1895_v60  ;;  %v680_v53 = vadd.f32 %v664_v43, %v630_v61  ;;  %v666_v20 = vmul.f32 %v1451_v57, %v2153_v7 }
  0x9e   : > { %v632_v62 = vadd.f32 %v616_v40, %v583_v15  ;;  %v1191_v41 = vpop.eup %1190  ;;  %970 = vst.msk [vmem:[%s1868_s4 + $0x8] sm:$0xf] %vm967_vm3, %v953_v35  ;;  %v892_v51 = vmul.f32 0.7978846, %v876_v21  ;;  %v715_v4 = vmul.f32 %v1464_v63, %v2154_v49  ;;  %v535_v1 = vadd.f32 %v2155_v44, %v1687_v31  ;;  %v2159_v15 = vld [vmem:[#allocation36_spill] sm:$0xff] }
  0x9f   : > { %v954_v5 = vpack.c.bf16 %v938_v36, %v938_v36  ;;  %v923_v55 = vadd.f32 1.0, %v1191_v41  ;;  %v845_v8 = vmul.f32 %v829_v10, %v1895_v60  ;;  %v729_v50 = vadd.f32 %v713_v52, %v680_v53  ;;  %v2158_v52 = vld [vmem:[#allocation23_spill] sm:$0xff] }
  0xa0   : > { %v682_v13 = vadd.f32 %v666_v20, %v632_v62  ;;  %1192 = vtanh.f32 %v892_v51  ;;  %v764_v43 = vmul.f32 %v1466_v0, %v2156_v9  ;;  %v584_v24 = vadd.f32 %v2157_v2, %v535_v1  ;;  %v2160_v10 = vld [vmem:[#allocation27_spill] sm:$0xff] }
  0xa1   : > { %971 = vst.msk [vmem:[%s1868_s4 + $0xc] sm:$0xf] %vm967_vm3, %v954_v5  ;;  %v617_v18 = vmul.f32 %v1449_v56, %v2156_v9  ;;  %v939_v11 = vmul.f32 %v923_v55, %v811_v46  ;;  %v861_v31 = vmul.f32 %v845_v8, %v1895_v60  ;;  %v778_v12 = vadd.f32 %v762_v17, %v729_v50  ;;  %v2161_v62 = vld [vmem:[#allocation31_spill] sm:$0xff] }
  0xa2   : > { %v731_v25 = vadd.f32 %v715_v4, %v682_v13  ;;  %v1927_v45 = vmul.f32 %v1433_v47, %v1914_v54  ;;  %v667_v23 = vmul.f32 %v1451_v57, %v2158_v52  ;;  %v536_v40 = vadd.f32 %v2159_v15, %v1705_v33 }
  0xa3   : > { %v633_v61 = vadd.f32 %v617_v18, %v584_v24  ;;  %v955_v35 = vpack.c.bf16 %v939_v11, %v939_v11  ;;  %v877_v36 = vadd.f32 %v861_v31, %v1895_v60  ;;  %v1935_v46 = vadd.f32 %v1789_v19, %v778_v12 }
  0xa4   : > { %v780_v21 = vadd.f32 %v764_v43, %v731_v25  ;;  %v716_v53 = vmul.f32 %v1464_v63, %v2160_v10  ;;  %v585_v47 = vadd.f32 %v1685_v58, %v536_v40  ;;  %v618_v7 = vmul.f32 %v1449_v56, %v2161_v62 }
  0xa5   : > { %v683_v17 = vadd.f32 %v667_v23, %v633_v61  ;;  %972 = vst.msk [vmem:[%s1868_s4 + $0x10] sm:$0xf] %vm967_vm3, %v955_v35  ;;  %v812_v33 = vmul.f32 0.5, %v1874_v14  ;;  %v893_v20 = vmul.f32 0.7978846, %v877_v36  ;;  %v765_v5 = vmul.f32 %v1466_v0, %v2161_v62  ;;  %v2163_v36 = vld [vmem:[#allocation37_spill] sm:$0xff] }
  0xa6   : > { %v1946_v41 = vadd.f32 %v1789_v19, %v780_v21  ;;  %v1193_v51 = vpop.eup %1192  ;;  %v830_v49 = vmul.f32 0.044715, %v1935_v46  ;;  %v634_v44 = vadd.f32 %v618_v7, %v585_v47  ;;  %v668_v58 = vmul.f32 %v1451_v57, %v1619_v42  ;;  %v2164_v21 = vld [vmem:[#allocation38_spill] sm:$0xff] }
  0xa7   : > { %v732_v4 = vadd.f32 %v716_v53, %v683_v17  ;;  %v924_v1 = vadd.f32 1.0, %v1193_v51  ;;  %1194 = vtanh.f32 %v893_v20  ;;  %v717_v14 = vmul.f32 %v1464_v63, %v1633_v28 }
  0xa8   : > { %v832_v55 = vmul.f32 0.044715, %v1946_v41  ;;  %v846_v8 = vmul.f32 %v830_v49, %v1935_v46  ;;  %v684_v13 = vadd.f32 %v668_v58, %v634_v44  ;;  %v537_v9 = vadd.f32 %v1691_v59, %v1719_v3 }
  0xa9   : > { %v781_v50 = vadd.f32 %v765_v5, %v732_v4  ;;  %v940_v43 = vmul.f32 %v924_v1, %v812_v33  ;;  %v813_v2 = vmul.f32 0.5, %v1895_v60  ;;  %v766_v24 = vmul.f32 %v1466_v0, %v1669_v30  ;;  %v2162_v60 = vld [vmem:[#allocation32_spill] sm:$0xff]  ;;  %v2165_v33 = vld [vmem:[#allocation39_spill] sm:$0xff] }
  0xaa   : > { %v848_v42 = vmul.f32 %v832_v55, %v1946_v41  ;;  %v862_v18 = vmul.f32 %v846_v8, %v1935_v46  ;;  %v733_v11 = vadd.f32 %v717_v14, %v684_v13  ;;  %v586_v31 = vadd.f32 %v1703_v29, %v537_v9 }
  0xab   : > { %v1965_v28 = vadd.f32 %v1789_v19, %v781_v50  ;;  %v956_v12 = vpack.c.bf16 %v940_v43, %v940_v43  ;;  %v619_v3 = vmul.f32 %v1449_v56, %v1669_v30  ;;  %v669_v25 = vmul.f32 %v1451_v57, %v2162_v60  ;;  %v605_v43 = vld [vmem:[#allocation2 + $0x122] sm:$0xff] }
  0xac   : > { %v864_v59 = vmul.f32 %v848_v42, %v1946_v41  ;;  %v878_v61 = vadd.f32 %v862_v18, %v1935_v46  ;;  %v782_v23 = vadd.f32 %v766_v24, %v733_v11  ;;  %v718_v15 = vmul.f32 %v1464_v63, %v1647_v48 }
  0xad   : > { %v833_v52 = vmul.f32 0.044715, %v1965_v28  ;;  %v1195_v40 = vpop.eup %1194  ;;  %973 = vst.msk [vmem:[%s1868_s4 + $0x14] sm:$0xf] %vm967_vm3, %v956_v12  ;;  %v635_v35 = vadd.f32 %v619_v3, %v586_v31  ;;  %v767_v30 = vmul.f32 %v1466_v0, %v2163_v36  ;;  %v538_v17 = vadd.f32 %v2164_v21, %v1739_v37 }
  0xae   : > { %v880_v29 = vadd.f32 %v864_v59, %v1946_v41  ;;  %v925_v10 = vadd.f32 1.0, %v1195_v40  ;;  %v894_v53 = vmul.f32 0.7978846, %v878_v61  ;;  %v1986_v62 = vadd.f32 %v1789_v19, %v782_v23 }
  0xaf   : > { %v849_v47 = vmul.f32 %v833_v52, %v1965_v28  ;;  %v685_v7 = vadd.f32 %v669_v25, %v635_v35  ;;  %v587_v20 = vadd.f32 %v2165_v33, %v538_v17  ;;  %v620_v5 = vmul.f32 %v1449_v56, %v2163_v36 }
  0xb0   : > { %v896_v48 = vmul.f32 0.7978846, %v880_v29  ;;  %v941_v51 = vmul.f32 %v925_v10, %v813_v2  ;;  %1196 = vtanh.f32 %v894_v53  ;;  %v670_v37 = vmul.f32 %v1451_v57, %v1671_v6 }
  0xb1   : > { %v865_v49 = vmul.f32 %v849_v47, %v1965_v28  ;;  %v834_v4 = vmul.f32 0.044715, %v1986_v62  ;;  %v734_v44 = vadd.f32 %v718_v15, %v685_v7  ;;  %v636_v58 = vadd.f32 %v620_v5, %v587_v20 }
  0xb2   : > { %1198 = vtanh.f32 %v896_v48  ;;  %v957_v1 = vpack.c.bf16 %v941_v51, %v941_v51  ;;  %v814_v55 = vmul.f32 0.5, %v1935_v46  ;;  %v719_v8 = vmul.f32 %v1464_v63, %v1673_v27  ;;  %v753_v48 = vld [vmem:[#allocation2 + $0x132] sm:$0xff] }
  0xb3   : > { %v881_v14 = vadd.f32 %v865_v49, %v1965_v28  ;;  %v850_v50 = vmul.f32 %v834_v4, %v1986_v62  ;;  %v783_v13 = vadd.f32 %v767_v30, %v734_v44  ;;  %v686_v9 = vadd.f32 %v670_v37, %v636_v58  ;;  %v704_v30 = vld [vmem:[#allocation2 + $0x131] sm:$0xff] }
  0xb4   : > { %v539_v6 = vadd.f32 %v1727_v38, %v1729_v26  ;;  %974 = vst.msk [vmem:[%s1868_s4 + $0x18] sm:$0xf] %vm967_vm3, %v957_v1  ;;  %v816_v2 = vmul.f32 0.5, %v1946_v41  ;;  %v768_v46 = vmul.f32 %v1466_v0, %v1693_v39  ;;  %v621_v24 = vmul.f32 %v1449_v56, %v1693_v39  ;;  %v655_v39 = vld [vmem:[#allocation2 + $0x130] sm:$0xff] }
  0xb5   : > { %v897_v42 = vmul.f32 0.7978846, %v881_v14  ;;  %v866_v27 = vmul.f32 %v850_v50, %v1986_v62  ;;  %v2011_v18 = vadd.f32 %v1789_v19, %v783_v13  ;;  %v735_v11 = vadd.f32 %v719_v8, %v686_v9 }
  0xb6   : > { %v588_v26 = vadd.f32 %v1737_v32, %v539_v6  ;;  %v1197_v38 = vpop.eup %1196  ;;  %v671_v41 = vmul.f32 %v1451_v57, %v1723_v34  ;;  %v720_v31 = vmul.f32 %v1464_v63, %v1914_v54  ;;  %v540_v12 = vadd.f32 %v1749_v22, %v1741_v16 }
  0xb7   : > { %1200 = vtanh.f32 %v897_v42  ;;  %v926_v3 = vadd.f32 1.0, %v1197_v38  ;;  %v882_v60 = vadd.f32 %v866_v27, %v1986_v62  ;;  %v835_v25 = vmul.f32 0.044715, %v2011_v18 }
  0xb8   : > { %v1199_v59 = vpop.eup %1198  ;;  %v622_v32 = vmul.f32 %v1449_v56, %v605_v43  ;;  %v784_v52 = vadd.f32 %v768_v46, %v735_v11  ;;  %v637_v23 = vadd.f32 %v621_v24, %v588_v26  ;;  %v589_v34 = vadd.f32 %v1927_v45, %v540_v12 }
  0xb9   : > { %v928_v61 = vadd.f32 1.0, %v1199_v59  ;;  %v942_v15 = vmul.f32 %v926_v3, %v814_v55  ;;  %v898_v40 = vmul.f32 0.7978846, %v882_v60  ;;  %v851_v54 = vmul.f32 %v835_v25, %v2011_v18 }
  0xba   : > { %v672_v16 = vmul.f32 %v1451_v57, %v655_v39  ;;  %v804_v29 = vadd.f32 %v1789_v19, %v784_v52  ;;  %v687_v35 = vadd.f32 %v671_v41, %v637_v23  ;;  %v638_v36 = vadd.f32 %v622_v32, %v589_v34 }
  0xbb   : > { %v944_v22 = vmul.f32 %v928_v61, %v816_v2  ;;  %v958_v56 = vpack.c.bf16 %v942_v15, %v942_v15  ;;  %v817_v21 = vmul.f32 0.5, %v1965_v28  ;;  %1202 = vtanh.f32 %v898_v40 }
  0xbc   : > { %v867_v45 = vmul.f32 %v851_v54, %v2011_v18  ;;  %v836_v53 = vmul.f32 0.044715, %v804_v29  ;;  %v736_v47 = vadd.f32 %v720_v31, %v687_v35  ;;  %v769_v57 = vmul.f32 %v1466_v0, %v605_v43 }
  0xbd   : > { %v1201_v17 = vpop.eup %1200  ;;  %v960_v10 = vpack.c.bf16 %v944_v22, %v944_v22  ;;  %975 = vst.msk [vmem:[%s1868_s4 + $0x1c] sm:$0xf] %vm967_vm3, %v958_v56  ;;  %v688_v20 = vadd.f32 %v672_v16, %v638_v36  ;;  %v721_v5 = vmul.f32 %v1464_v63, %v704_v30  ;;  %v770_v44 = vmul.f32 %v1466_v0, %v753_v48 }
  0xbe   : > { %v929_v7 = vadd.f32 1.0, %v1201_v17  ;;  %v883_v33 = vadd.f32 %v867_v45, %v2011_v18  ;;  %v852_v28 = vmul.f32 %v836_v53, %v804_v29  ;;  %v785_v51 = vadd.f32 %v769_v57, %v736_v47 }
  0xbf   : > { %977 = vst.msk [vmem:[%s1868_s4 + $0x24] sm:$0xf] %vm967_vm3, %v960_v10  ;;  %v737_v4 = vadd.f32 %v721_v5, %v688_v20  ;;  %v818_v63 = vmul.f32 0.5, %v1986_v62  ;;  %v819_v62 = vmul.f32 0.5, %v2011_v18  ;;  %v820_v3 = vmul.f32 0.5, %v804_v29 }
  0xc0   : > { %v945_v49 = vmul.f32 %v929_v7, %v817_v21  ;;  %v899_v37 = vmul.f32 0.7978846, %v883_v33  ;;  %v868_v58 = vmul.f32 %v852_v28, %v804_v29  ;;  %v805_v1 = vadd.f32 %v1789_v19, %v785_v51 }
  0xc1   : > { %v1203_v55 = vpop.eup %1202  ;;  %v786_v8 = vadd.f32 %v770_v44, %v737_v4 }
  0xc2   : > { %v961_v14 = vpack.c.bf16 %v945_v49, %v945_v49  ;;  %1204 = vtanh.f32 %v899_v37  ;;  %v930_v50 = vadd.f32 1.0, %v1203_v55  ;;  %v884_v13 = vadd.f32 %v868_v58, %v804_v29 }
  0xc3   : > { %v837_v9 = vmul.f32 0.044715, %v805_v1  ;;  %v806_v6 = vadd.f32 %v1789_v19, %v786_v8  ;;  %v821_v52 = vmul.f32 0.5, %v805_v1 }
  0xc4   : > { %978 = vst.msk [vmem:[%s1868_s4 + $0x28] sm:$0xf] %vm967_vm3, %v961_v14  ;;  %v946_v43 = vmul.f32 %v930_v50, %v818_v63  ;;  %v900_v2 = vmul.f32 0.7978846, %v884_v13 }
  0xc5   : > { %v853_v0 = vmul.f32 %v837_v9, %v805_v1  ;;  %v838_v42 = vmul.f32 0.044715, %v806_v6  ;;  %v822_v40 = vmul.f32 0.5, %v806_v6 }
  0xc6   : > { %v962_v46 = vpack.c.bf16 %v946_v43, %v946_v43  ;;  %1206 = vtanh.f32 %v900_v2 }
  0xc7   : > { %v869_v24 = vmul.f32 %v853_v0, %v805_v1  ;;  %v854_v11 = vmul.f32 %v838_v42, %v806_v6 }
  0xc8   : > { %v1205_v27 = vpop.eup %1204  ;;  %979 = vst.msk [vmem:[%s1868_s4 + $0x2c] sm:$0xf] %vm967_vm3, %v962_v46 }
  0xc9   : > { %v931_v26 = vadd.f32 1.0, %v1205_v27  ;;  %v885_v38 = vadd.f32 %v869_v24, %v805_v1  ;;  %v870_v41 = vmul.f32 %v854_v11, %v806_v6 }
  0xcb   : > { %v947_v31 = vmul.f32 %v931_v26, %v819_v62  ;;  %v901_v19 = vmul.f32 0.7978846, %v885_v38  ;;  %v886_v12 = vadd.f32 %v870_v41, %v806_v6 }
  0xcc   : > { %v1207_v39 = vpop.eup %1206 }
  0xcd   : > { %v963_v59 = vpack.c.bf16 %v947_v31, %v947_v31  ;;  %1208 = vtanh.f32 %v901_v19  ;;  %v932_v60 = vadd.f32 1.0, %v1207_v39  ;;  %v902_v25 = vmul.f32 0.7978846, %v886_v12 }
  0xcf   : > { %980 = vst.msk [vmem:[%s1868_s4 + $0x30] sm:$0xf] %vm967_vm3, %v963_v59  ;;  %v948_v32 = vmul.f32 %v932_v60, %v820_v3  ;;  %1210 = vtanh.f32 %v902_v25 }
  0xd1   : > { %v964_v18 = vpack.c.bf16 %v948_v32, %v948_v32 }
  0xd3   : > { %v1209_v61 = vpop.eup %1208  ;;  %981 = vst.msk [vmem:[%s1868_s4 + $0x34] sm:$0xf] %vm967_vm3, %v964_v18 }
  0xd4   : > { %v933_v23 = vadd.f32 1.0, %v1209_v61 }
  0xd5   : > { %v1211_v34 = vpop.eup %1210 }
  0xd6   : > { %v949_v15 = vmul.f32 %v933_v23, %v821_v52  ;;  %v934_v54 = vadd.f32 1.0, %v1211_v34 }
  0xd8   : > { %v965_v16 = vpack.c.bf16 %v949_v15, %v949_v15  ;;  %v950_v22 = vmul.f32 %v934_v54, %v822_v40 }
  0xda   : > { %982 = vst.msk [vmem:[%s1868_s4 + $0x38] sm:$0xf] %vm967_vm3, %v965_v16  ;;  %v966_v29 = vpack.c.bf16 %v950_v22, %v950_v22 }
  0xdc   : > { %983 = vst.msk [vmem:[%s1868_s4 + $0x3c] sm:$0xf] %vm967_vm3, %v966_v29 }
  0xdd PF: > { %s13_s14 = sadd.s32 1, %s1234_s14   ;;  %s2166_s12 = smov %s1230_s13 }
  0xde   : > { %p10_p5 = scmp.ge.s32.totalorder %s13_s14, 4   ;;  %s2167_s13 = smov %s2169_s15 }
  0xe0   :  { %12 = sbr.rel (!%p10_p5) target bundleno = 2 (0x2), region = 71 }

</bundles_post_ra>
